<compile_context>
chip_gen: v5e
topology: v5e:2x2
jax: 0.10.0
libtpu: 0.0.40
codegen_flags: <defaults>
</compile_context>

<pallas_src>
import numpy as np

import jax
import jax.numpy as jnp
from jax.experimental import pallas as pl
from jax.experimental.pallas import tpu as pltpu


# ---------------------------------------------------------------------------
# One-time weight preparation (hoisted out of the jitted forward)
# ---------------------------------------------------------------------------
def _conv_toeplitz(w_oihw, S):
    """Banded weight slab for a 5x5 stride-1 pad-2 conv on an SxS image.

    Returns T[5, (S+4)*Cin, 256] with
      T[di, q*Cin+ci, col(w, co)] = w[co, ci, di, q - w]   (0 <= q - w < 5)
    where col(w, co) = (w//2)*Cout + co           for even w  (lanes [0, 128))
                     = 128 + (w//2)*Cout + co     for odd  w  (lanes [128, 256))
    so that acc[h] = sum_di x_pad[h+di, :] @ T[di] is the conv output row h with
    even/odd output columns separated into two 128-lane blocks (pool-friendly).
    """
    w = np.asarray(w_oihw, np.float32)
    Cout, Cin, KH, KW = w.shape
    assert (S // 2) * Cout <= 128
    T = np.zeros((KH, (S + 4) * Cin, 256), np.float32)
    for wout in range(S):
        base = (wout // 2) * Cout + (0 if wout % 2 == 0 else 128)
        for di in range(KH):
            for dj in range(KW):
                q = wout + dj
                for ci in range(Cin):
                    T[di, q * Cin + ci, base:base + Cout] = w[:, ci, di, dj]
    return T


def _conv_bias_row(b, S):
    b = np.asarray(b, np.float32)
    Cout, half = b.shape[0], S // 2
    row = np.zeros((1, 256), np.float32)
    row[0, :half * Cout] = np.tile(b, half)
    row[0, 128:128 + half * Cout] = np.tile(b, half)
    return row


def _pool_selectors(S):
    """0/1 matrices selecting even / odd rows (exact row gather via the MXU)."""
    E = np.zeros((S // 2, S), np.float32)
    O = np.zeros((S // 2, S), np.float32)
    idx = np.arange(S // 2)
    E[idx, 2 * idx] = 1.0
    O[idx, 2 * idx + 1] = 1.0
    return E, O


def prepare_params(params):
    """PyTorch-layout params -> padded, permuted kernel constants (run once)."""
    prep = {
        "t1": _conv_toeplitz(params["conv1_w"], 28),
        "c1b": _conv_bias_row(params["conv1_b"], 28),
        "t2": _conv_toeplitz(params["conv2_w"], 14),
        "c2b": _conv_bias_row(params["conv2_b"], 14),
    }
    prep["e1"], prep["o1"] = _pool_selectors(28)
    prep["e2"], prep["o2"] = _pool_selectors(14)

    # fc1: fold PyTorch's (C,H,W) flatten into the weight layout so the kernel can
    # consume the pooled NHWC rows [h, w*16+c] directly; pad N 120->128 and each
    # per-row K chunk 112->128 (zero rows) so all in-kernel slices are 128-aligned.
    w1 = np.asarray(params["fc1_w"], np.float32)           # [120, 784], idx = c*49+h*7+w
    w1 = w1.reshape(120, 16, 7, 7).transpose(0, 2, 3, 1)   # [120, 7, 7, 16]  (n,h,w,c)
    w1 = w1.reshape(120, 7, 112)                           # [120, 7, w*16+c]
    w1p = np.zeros((7, 128, 128), np.float32)
    w1p[:, :112, :120] = w1.transpose(1, 2, 0)             # [7, 112, 120]
    prep["w1"] = w1p.reshape(896, 128)                     # row = h*128 + (w*16+c)
    b1p = np.zeros((1, 128), np.float32)
    b1p[0, :120] = np.asarray(params["fc1_b"], np.float32)
    prep["b1"] = b1p

    w2p = np.zeros((128, 128), np.float32)
    w2p[:120, :84] = np.asarray(params["fc2_w"], np.float32).T
    prep["w2"] = w2p
    b2p = np.zeros((1, 128), np.float32)
    b2p[0, :84] = np.asarray(params["fc2_b"], np.float32)
    prep["b2"] = b2p

    w3p = np.zeros((128, 128), np.float32)
    w3p[:84, :10] = np.asarray(params["fc3_w"], np.float32).T
    prep["w3"] = w3p
    b3p = np.zeros((1, 128), np.float32)
    b3p[0, :10] = np.asarray(params["fc3_b"], np.float32)
    prep["b3"] = b3p

    return {k: jnp.asarray(v) for k, v in prep.items()}


_CONSTS = ("t1", "c1b", "e1", "o1", "t2", "c2b", "e2", "o2",
           "w1", "b1", "w2", "b2", "w3", "b3")


# ---------------------------------------------------------------------------
# The fused whole-network kernel (one grid step = one image)
# ---------------------------------------------------------------------------
def _lenet_kernel(x_ref, t1_ref, c1b_ref, e1_ref, o1_ref,
                  t2_ref, c2b_ref, e2_ref, o2_ref,
                  w1_ref, b1_ref, w2_ref, b2_ref, w3_ref, b3_ref,
                  out_ref, x2_ref):
    f32 = jnp.float32

    # ---- conv1 (5x5, pad 2) + bias + ReLU: 5 row-shifted Toeplitz matmuls ----
    acc1 = jnp.zeros((28, 256), f32)
    for di in range(5):
        acc1 += jnp.dot(x_ref[di:di + 28, :], t1_ref[di],
                        preferred_element_type=f32)
    acc1 = jnp.maximum(acc1 + c1b_ref[...], 0.0)

    # ---- maxpool 2x2: width via even/odd 128-lane blocks, height via 0/1 matmuls
    a1 = jnp.maximum(acc1[:, :128], acc1[:, 128:])                     # [28, 128]
    p1 = jnp.maximum(jnp.dot(e1_ref[...], a1, preferred_element_type=f32),
                     jnp.dot(o1_ref[...], a1, preferred_element_type=f32))  # [14, 128]

    # ---- stage zero-padded conv2 input (NHWC rows, lane = q*6+ci) in VMEM scratch
    x2_ref[...] = jnp.zeros((18, 108), f32)
    x2_ref[2:16, 12:96] = p1[:, :84]

    # ---- conv2 (5x5, pad 2, 6->16) + bias + ReLU ----
    acc2 = jnp.zeros((14, 256), f32)
    for di in range(5):
        acc2 += jnp.dot(x2_ref[di:di + 14, :], t2_ref[di],
                        preferred_element_type=f32)
    acc2 = jnp.maximum(acc2 + c2b_ref[...], 0.0)

    # ---- maxpool 2x2 ----
    a2 = jnp.maximum(acc2[:, :128], acc2[:, 128:])                     # [14, 128]
    p2 = jnp.maximum(jnp.dot(e2_ref[...], a2, preferred_element_type=f32),
                     jnp.dot(o2_ref[...], a2, preferred_element_type=f32))  # [7, 128]

    # ---- fc1 (PyTorch flatten folded into w1 layout) + ReLU ----
    h1 = b1_ref[...]
    for h in range(7):
        h1 += jnp.dot(p2[h:h + 1, :], w1_ref[h * 128:(h + 1) * 128, :],
                      preferred_element_type=f32)
    h1 = jnp.maximum(h1, 0.0)

    # ---- fc2 + ReLU, fc3 ----
    h2 = jnp.maximum(
        jnp.dot(h1, w2_ref[...], preferred_element_type=f32) + b2_ref[...], 0.0)
    out_ref[...] = jnp.dot(h2, w3_ref[...], preferred_element_type=f32) + b3_ref[...]


def _const_spec(arr):
    zeros = (0,) * arr.ndim
    return pl.BlockSpec(arr.shape, lambda i, _z=zeros: _z)


@jax.jit
def lenet_forward(x_nchw, prep):
    B = x_nchw.shape[0]
    x = x_nchw.reshape(B, 28, 28)                       # Cin = 1
    x = jnp.pad(x, ((0, 0), (2, 2), (2, 2)))            # [B, 32, 32] ("same" padding)

    consts = tuple(prep[k] for k in _CONSTS)
    in_specs = [pl.BlockSpec((None, 32, 32), lambda i: (i, 0, 0))]
    in_specs += [_const_spec(c) for c in consts]

    out = pl.pallas_call(
        _lenet_kernel,
        out_shape=jax.ShapeDtypeStruct((B, 1, 128), jnp.float32),
        grid=(B,),
        in_specs=in_specs,
        out_specs=pl.BlockSpec((None, 1, 128), lambda i: (i, 0, 0)),
        scratch_shapes=[pltpu.VMEM((18, 108), jnp.float32)],
        compiler_params=pltpu.CompilerParams(dimension_semantics=("parallel",)),
    )(x, *consts)
    return out[:, 0, :10]


# ---------------------------------------------------------------------------
# Deterministic parameter init (shapes match the PyTorch module) + reference
# ---------------------------------------------------------------------------
def init_params(key):
    def uniform(k, shape, fan_in):
        bound = 1.0 / jnp.sqrt(jnp.float32(fan_in))
        return jax.random.uniform(k, shape, jnp.float32, -bound, bound)

    ks = jax.random.split(key, 10)
    return {
        "conv1_w": uniform(ks[0], (6, 1, 5, 5), 1 * 5 * 5),
        "conv1_b": uniform(ks[1], (6,), 1 * 5 * 5),
        "conv2_w": uniform(ks[2], (16, 6, 5, 5), 6 * 5 * 5),
        "conv2_b": uniform(ks[3], (16,), 6 * 5 * 5),
        "fc1_w": uniform(ks[4], (120, 784), 784),   # PyTorch Linear: [out, in]
        "fc1_b": uniform(ks[5], (120,), 784),
        "fc2_w": uniform(ks[6], (84, 120), 120),
        "fc2_b": uniform(ks[7], (84,), 120),
        "fc3_w": uniform(ks[8], (10, 84), 84),
        "fc3_b": uniform(ks[9], (10,), 84),
    }


def lenet_reference(x, params):
    """Pure-JAX (XLA) reference matching the PyTorch forward."""
    hp = jax.lax.Precision.HIGHEST

    def conv(x, w, b):
        y = jax.lax.conv_general_dilated(
            x, w, window_strides=(1, 1), padding=((2, 2), (2, 2)),
            dimension_numbers=("NCHW", "OIHW", "NCHW"), precision=hp)
        return jax.nn.relu(y + b[None, :, None, None])

    def pool(x):
        return jax.lax.reduce_window(x, -jnp.inf, jax.lax.max,
                                     (1, 1, 2, 2), (1, 1, 2, 2), "VALID")

    x = pool(conv(x, params["conv1_w"], params["conv1_b"]))
    x = pool(conv(x, params["conv2_w"], params["conv2_b"]))
    x = x.reshape(x.shape[0], -1)
    x = jax.nn.relu(jnp.dot(x, params["fc1_w"].T, precision=hp) + params["fc1_b"])
    x = jax.nn.relu(jnp.dot(x, params["fc2_w"].T, precision=hp) + params["fc2_b"])
    return jnp.dot(x, params["fc3_w"].T, precision=hp) + params["fc3_b"]


if __name__ == "__main__":
    key = jax.random.PRNGKey(0)
    k_x, k_p = jax.random.split(key)
    # LeNet forward implies MNIST-style input: 1 channel, 28x28 spatial.
    x = jax.random.normal(k_x, (2, 1, 28, 28), dtype=jnp.float32)
    params = init_params(k_p)

    prep = prepare_params(params)            # one-time weight prep (outside the jit)

    out = jax.block_until_ready(lenet_forward(x, prep))
    assert out.shape == (2, 10), out.shape

    ref = jax.block_until_ready(lenet_reference(x, params))
    np.testing.assert_allclose(np.asarray(out), np.asarray(ref),
                               rtol=2e-2, atol=2e-2)
    print("KERNEL_OK")
</pallas_src>

<mosaic_0001>
module attributes {stable_mosaic.version = 11 : i64} {
  func.func @_lenet_kernel(%arg0: i32, %arg1: memref<1x32x32xf32, #tpu.memory_space<vmem>>, %arg2: memref<5x32x256xf32, #tpu.memory_space<vmem>>, %arg3: memref<1x256xf32, #tpu.memory_space<vmem>>, %arg4: memref<14x28xf32, #tpu.memory_space<vmem>>, %arg5: memref<14x28xf32, #tpu.memory_space<vmem>>, %arg6: memref<5x108x256xf32, #tpu.memory_space<vmem>>, %arg7: memref<1x256xf32, #tpu.memory_space<vmem>>, %arg8: memref<7x14xf32, #tpu.memory_space<vmem>>, %arg9: memref<7x14xf32, #tpu.memory_space<vmem>>, %arg10: memref<896x128xf32, #tpu.memory_space<vmem>>, %arg11: memref<1x128xf32, #tpu.memory_space<vmem>>, %arg12: memref<128x128xf32, #tpu.memory_space<vmem>>, %arg13: memref<1x128xf32, #tpu.memory_space<vmem>>, %arg14: memref<128x128xf32, #tpu.memory_space<vmem>>, %arg15: memref<1x128xf32, #tpu.memory_space<vmem>>, %arg16: memref<1x1x128xf32, #tpu.memory_space<vmem>>, %arg17: memref<18x108xf32, #tpu.memory_space<vmem>>) attributes {dimension_semantics = [#tpu.dimension_semantics<parallel>], iteration_bounds = array<i64: 2>, scalar_prefetch = 0 : i64, scratch_operands = 1 : i64, tpu.core_type = #tpu.core_type<tc>, window_params = [{transform_indices = @transform_0, window_bounds = array<i64: 1, 32, 32>}, {pipeline_mode = #tpu.pipeline_mode<synchronous>, transform_indices = @transform_1, window_bounds = array<i64: 5, 32, 256>}, {pipeline_mode = #tpu.pipeline_mode<synchronous>, transform_indices = @transform_2, window_bounds = array<i64: 1, 256>}, {pipeline_mode = #tpu.pipeline_mode<synchronous>, transform_indices = @transform_3, window_bounds = array<i64: 14, 28>}, {pipeline_mode = #tpu.pipeline_mode<synchronous>, transform_indices = @transform_4, window_bounds = array<i64: 14, 28>}, {pipeline_mode = #tpu.pipeline_mode<synchronous>, transform_indices = @transform_5, window_bounds = array<i64: 5, 108, 256>}, {pipeline_mode = #tpu.pipeline_mode<synchronous>, transform_indices = @transform_6, window_bounds = array<i64: 1, 256>}, {pipeline_mode = #tpu.pipeline_mode<synchronous>, transform_indices = @transform_7, window_bounds = array<i64: 7, 14>}, {pipeline_mode = #tpu.pipeline_mode<synchronous>, transform_indices = @transform_8, window_bounds = array<i64: 7, 14>}, {pipeline_mode = #tpu.pipeline_mode<synchronous>, transform_indices = @transform_9, window_bounds = array<i64: 896, 128>}, {pipeline_mode = #tpu.pipeline_mode<synchronous>, transform_indices = @transform_10, window_bounds = array<i64: 1, 128>}, {pipeline_mode = #tpu.pipeline_mode<synchronous>, transform_indices = @transform_11, window_bounds = array<i64: 128, 128>}, {pipeline_mode = #tpu.pipeline_mode<synchronous>, transform_indices = @transform_12, window_bounds = array<i64: 1, 128>}, {pipeline_mode = #tpu.pipeline_mode<synchronous>, transform_indices = @transform_13, window_bounds = array<i64: 128, 128>}, {pipeline_mode = #tpu.pipeline_mode<synchronous>, transform_indices = @transform_14, window_bounds = array<i64: 1, 128>}, {transform_indices = @transform_15, window_bounds = array<i64: 1, 1, 128>}]} {
    %cst = arith.constant 0.000000e+00 : f32
    %0 = vector.broadcast %cst : f32 to vector<28x256xf32>
    %c0 = arith.constant 0 : index
    %c0_0 = arith.constant 0 : index
    %c0_1 = arith.constant 0 : index
    %1 = vector.load %arg1[%c0, %c0_0, %c0_1] : memref<1x32x32xf32, #tpu.memory_space<vmem>>, vector<1x28x32xf32>
    %2 = vector.shape_cast %1 : vector<1x28x32xf32> to vector<28x32xf32>
    %c0_2 = arith.constant 0 : index
    %c0_3 = arith.constant 0 : index
    %c0_4 = arith.constant 0 : index
    %3 = vector.load %arg2[%c0_2, %c0_3, %c0_4] : memref<5x32x256xf32, #tpu.memory_space<vmem>>, vector<1x32x256xf32>
    %4 = vector.shape_cast %3 : vector<1x32x256xf32> to vector<32x256xf32>
    %cst_5 = arith.constant dense<0.000000e+00> : vector<28x256xf32>
    %5 = tpu.matmul %2, %4, %cst_5 {dimension_numbers = #tpu.dot_dimension_numbers<[1], [0], [0], [1], [0, 0, 1, 1], [], []>} : vector<28x32xf32>, vector<32x256xf32>, vector<28x256xf32> -> vector<28x256xf32>
    %6 = arith.addf %0, %5 : vector<28x256xf32>
    %c0_6 = arith.constant 0 : index
    %c1 = arith.constant 1 : index
    %c0_7 = arith.constant 0 : index
    %7 = vector.load %arg1[%c0_6, %c1, %c0_7] : memref<1x32x32xf32, #tpu.memory_space<vmem>>, vector<1x28x32xf32>
    %8 = vector.shape_cast %7 : vector<1x28x32xf32> to vector<28x32xf32>
    %c1_8 = arith.constant 1 : index
    %c0_9 = arith.constant 0 : index
    %c0_10 = arith.constant 0 : index
    %9 = vector.load %arg2[%c1_8, %c0_9, %c0_10] : memref<5x32x256xf32, #tpu.memory_space<vmem>>, vector<1x32x256xf32>
    %10 = vector.shape_cast %9 : vector<1x32x256xf32> to vector<32x256xf32>
    %cst_11 = arith.constant dense<0.000000e+00> : vector<28x256xf32>
    %11 = tpu.matmul %8, %10, %cst_11 {dimension_numbers = #tpu.dot_dimension_numbers<[1], [0], [0], [1], [0, 0, 1, 1], [], []>} : vector<28x32xf32>, vector<32x256xf32>, vector<28x256xf32> -> vector<28x256xf32>
    %12 = arith.addf %6, %11 : vector<28x256xf32>
    %c0_12 = arith.constant 0 : index
    %c2 = arith.constant 2 : index
    %c0_13 = arith.constant 0 : index
    %13 = vector.load %arg1[%c0_12, %c2, %c0_13] : memref<1x32x32xf32, #tpu.memory_space<vmem>>, vector<1x28x32xf32>
    %14 = vector.shape_cast %13 : vector<1x28x32xf32> to vector<28x32xf32>
    %c2_14 = arith.constant 2 : index
    %c0_15 = arith.constant 0 : index
    %c0_16 = arith.constant 0 : index
    %15 = vector.load %arg2[%c2_14, %c0_15, %c0_16] : memref<5x32x256xf32, #tpu.memory_space<vmem>>, vector<1x32x256xf32>
    %16 = vector.shape_cast %15 : vector<1x32x256xf32> to vector<32x256xf32>
    %cst_17 = arith.constant dense<0.000000e+00> : vector<28x256xf32>
    %17 = tpu.matmul %14, %16, %cst_17 {dimension_numbers = #tpu.dot_dimension_numbers<[1], [0], [0], [1], [0, 0, 1, 1], [], []>} : vector<28x32xf32>, vector<32x256xf32>, vector<28x256xf32> -> vector<28x256xf32>
    %18 = arith.addf %12, %17 : vector<28x256xf32>
    %c0_18 = arith.constant 0 : index
    %c3 = arith.constant 3 : index
    %c0_19 = arith.constant 0 : index
    %19 = vector.load %arg1[%c0_18, %c3, %c0_19] : memref<1x32x32xf32, #tpu.memory_space<vmem>>, vector<1x28x32xf32>
    %20 = vector.shape_cast %19 : vector<1x28x32xf32> to vector<28x32xf32>
    %c3_20 = arith.constant 3 : index
    %c0_21 = arith.constant 0 : index
    %c0_22 = arith.constant 0 : index
    %21 = vector.load %arg2[%c3_20, %c0_21, %c0_22] : memref<5x32x256xf32, #tpu.memory_space<vmem>>, vector<1x32x256xf32>
    %22 = vector.shape_cast %21 : vector<1x32x256xf32> to vector<32x256xf32>
    %cst_23 = arith.constant dense<0.000000e+00> : vector<28x256xf32>
    %23 = tpu.matmul %20, %22, %cst_23 {dimension_numbers = #tpu.dot_dimension_numbers<[1], [0], [0], [1], [0, 0, 1, 1], [], []>} : vector<28x32xf32>, vector<32x256xf32>, vector<28x256xf32> -> vector<28x256xf32>
    %24 = arith.addf %18, %23 : vector<28x256xf32>
    %c0_24 = arith.constant 0 : index
    %c4 = arith.constant 4 : index
    %c0_25 = arith.constant 0 : index
    %25 = vector.load %arg1[%c0_24, %c4, %c0_25] : memref<1x32x32xf32, #tpu.memory_space<vmem>>, vector<1x28x32xf32>
    %26 = vector.shape_cast %25 : vector<1x28x32xf32> to vector<28x32xf32>
    %c4_26 = arith.constant 4 : index
    %c0_27 = arith.constant 0 : index
    %c0_28 = arith.constant 0 : index
    %27 = vector.load %arg2[%c4_26, %c0_27, %c0_28] : memref<5x32x256xf32, #tpu.memory_space<vmem>>, vector<1x32x256xf32>
    %28 = vector.shape_cast %27 : vector<1x32x256xf32> to vector<32x256xf32>
    %cst_29 = arith.constant dense<0.000000e+00> : vector<28x256xf32>
    %29 = tpu.matmul %26, %28, %cst_29 {dimension_numbers = #tpu.dot_dimension_numbers<[1], [0], [0], [1], [0, 0, 1, 1], [], []>} : vector<28x32xf32>, vector<32x256xf32>, vector<28x256xf32> -> vector<28x256xf32>
    %30 = arith.addf %24, %29 : vector<28x256xf32>
    %c0_30 = arith.constant 0 : index
    %c0_31 = arith.constant 0 : index
    %31 = vector.load %arg3[%c0_30, %c0_31] : memref<1x256xf32, #tpu.memory_space<vmem>>, vector<1x256xf32>
    %32 = vector.broadcast %31 : vector<1x256xf32> to vector<28x256xf32>
    %33 = arith.addf %30, %32 : vector<28x256xf32>
    %cst_32 = arith.constant 0.000000e+00 : f32
    %34 = vector.broadcast %cst_32 : f32 to vector<28x256xf32>
    %35 = arith.maximumf %33, %34 : vector<28x256xf32>
    %36 = vector.extract_strided_slice %35 {offsets = [0, 0], sizes = [28, 128], strides = [1, 1]} : vector<28x256xf32> to vector<28x128xf32>
    %37 = vector.extract_strided_slice %35 {offsets = [0, 128], sizes = [28, 128], strides = [1, 1]} : vector<28x256xf32> to vector<28x128xf32>
    %38 = arith.maximumf %36, %37 : vector<28x128xf32>
    %c0_33 = arith.constant 0 : index
    %c0_34 = arith.constant 0 : index
    %39 = vector.load %arg4[%c0_33, %c0_34] : memref<14x28xf32, #tpu.memory_space<vmem>>, vector<14x28xf32>
    %cst_35 = arith.constant dense<0.000000e+00> : vector<14x128xf32>
    %40 = tpu.matmul %39, %38, %cst_35 {dimension_numbers = #tpu.dot_dimension_numbers<[1], [0], [0], [1], [0, 0, 1, 1], [], []>} : vector<14x28xf32>, vector<28x128xf32>, vector<14x128xf32> -> vector<14x128xf32>
    %c0_36 = arith.constant 0 : index
    %c0_37 = arith.constant 0 : index
    %41 = vector.load %arg5[%c0_36, %c0_37] : memref<14x28xf32, #tpu.memory_space<vmem>>, vector<14x28xf32>
    %cst_38 = arith.constant dense<0.000000e+00> : vector<14x128xf32>
    %42 = tpu.matmul %41, %38, %cst_38 {dimension_numbers = #tpu.dot_dimension_numbers<[1], [0], [0], [1], [0, 0, 1, 1], [], []>} : vector<14x28xf32>, vector<28x128xf32>, vector<14x128xf32> -> vector<14x128xf32>
    %43 = arith.maximumf %40, %42 : vector<14x128xf32>
    %cst_39 = arith.constant 0.000000e+00 : f32
    %44 = vector.broadcast %cst_39 : f32 to vector<18x108xf32>
    %c0_40 = arith.constant 0 : index
    %c0_41 = arith.constant 0 : index
    %45 = vector.load %arg17[%c0_40, %c0_41] : memref<18x108xf32, #tpu.memory_space<vmem>>, vector<18x108xf32>
    tpu.vector_store %arg17[%c0_40, %c0_41], %44 {strides = array<i32>} : memref<18x108xf32, #tpu.memory_space<vmem>>, vector<18x108xf32>,
    %46 = vector.extract_strided_slice %43 {offsets = [0, 0], sizes = [14, 84], strides = [1, 1]} : vector<14x128xf32> to vector<14x84xf32>
    %c2_42 = arith.constant 2 : index
    %c12 = arith.constant 12 : index
    %47 = vector.load %arg17[%c2_42, %c12] : memref<18x108xf32, #tpu.memory_space<vmem>>, vector<14x84xf32>
    tpu.vector_store %arg17[%c2_42, %c12], %46 {strides = array<i32>} : memref<18x108xf32, #tpu.memory_space<vmem>>, vector<14x84xf32>,
    %cst_43 = arith.constant 0.000000e+00 : f32
    %48 = vector.broadcast %cst_43 : f32 to vector<14x256xf32>
    %c0_44 = arith.constant 0 : index
    %c0_45 = arith.constant 0 : index
    %49 = vector.load %arg17[%c0_44, %c0_45] : memref<18x108xf32, #tpu.memory_space<vmem>>, vector<14x108xf32>
    %c0_46 = arith.constant 0 : index
    %c0_47 = arith.constant 0 : index
    %c0_48 = arith.constant 0 : index
    %50 = vector.load %arg6[%c0_46, %c0_47, %c0_48] : memref<5x108x256xf32, #tpu.memory_space<vmem>>, vector<1x108x256xf32>
    %51 = vector.shape_cast %50 : vector<1x108x256xf32> to vector<108x256xf32>
    %cst_49 = arith.constant dense<0.000000e+00> : vector<14x256xf32>
    %52 = tpu.matmul %49, %51, %cst_49 {dimension_numbers = #tpu.dot_dimension_numbers<[1], [0], [0], [1], [0, 0, 1, 1], [], []>} : vector<14x108xf32>, vector<108x256xf32>, vector<14x256xf32> -> vector<14x256xf32>
    %53 = arith.addf %48, %52 : vector<14x256xf32>
    %c1_50 = arith.constant 1 : index
    %c0_51 = arith.constant 0 : index
    %54 = vector.load %arg17[%c1_50, %c0_51] : memref<18x108xf32, #tpu.memory_space<vmem>>, vector<14x108xf32>
    %c1_52 = arith.constant 1 : index
    %c0_53 = arith.constant 0 : index
    %c0_54 = arith.constant 0 : index
    %55 = vector.load %arg6[%c1_52, %c0_53, %c0_54] : memref<5x108x256xf32, #tpu.memory_space<vmem>>, vector<1x108x256xf32>
    %56 = vector.shape_cast %55 : vector<1x108x256xf32> to vector<108x256xf32>
    %cst_55 = arith.constant dense<0.000000e+00> : vector<14x256xf32>
    %57 = tpu.matmul %54, %56, %cst_55 {dimension_numbers = #tpu.dot_dimension_numbers<[1], [0], [0], [1], [0, 0, 1, 1], [], []>} : vector<14x108xf32>, vector<108x256xf32>, vector<14x256xf32> -> vector<14x256xf32>
    %58 = arith.addf %53, %57 : vector<14x256xf32>
    %c2_56 = arith.constant 2 : index
    %c0_57 = arith.constant 0 : index
    %59 = vector.load %arg17[%c2_56, %c0_57] : memref<18x108xf32, #tpu.memory_space<vmem>>, vector<14x108xf32>
    %c2_58 = arith.constant 2 : index
    %c0_59 = arith.constant 0 : index
    %c0_60 = arith.constant 0 : index
    %60 = vector.load %arg6[%c2_58, %c0_59, %c0_60] : memref<5x108x256xf32, #tpu.memory_space<vmem>>, vector<1x108x256xf32>
    %61 = vector.shape_cast %60 : vector<1x108x256xf32> to vector<108x256xf32>
    %cst_61 = arith.constant dense<0.000000e+00> : vector<14x256xf32>
    %62 = tpu.matmul %59, %61, %cst_61 {dimension_numbers = #tpu.dot_dimension_numbers<[1], [0], [0], [1], [0, 0, 1, 1], [], []>} : vector<14x108xf32>, vector<108x256xf32>, vector<14x256xf32> -> vector<14x256xf32>
    %63 = arith.addf %58, %62 : vector<14x256xf32>
    %c3_62 = arith.constant 3 : index
    %c0_63 = arith.constant 0 : index
    %64 = vector.load %arg17[%c3_62, %c0_63] : memref<18x108xf32, #tpu.memory_space<vmem>>, vector<14x108xf32>
    %c3_64 = arith.constant 3 : index
    %c0_65 = arith.constant 0 : index
    %c0_66 = arith.constant 0 : index
    %65 = vector.load %arg6[%c3_64, %c0_65, %c0_66] : memref<5x108x256xf32, #tpu.memory_space<vmem>>, vector<1x108x256xf32>
    %66 = vector.shape_cast %65 : vector<1x108x256xf32> to vector<108x256xf32>
    %cst_67 = arith.constant dense<0.000000e+00> : vector<14x256xf32>
    %67 = tpu.matmul %64, %66, %cst_67 {dimension_numbers = #tpu.dot_dimension_numbers<[1], [0], [0], [1], [0, 0, 1, 1], [], []>} : vector<14x108xf32>, vector<108x256xf32>, vector<14x256xf32> -> vector<14x256xf32>
    %68 = arith.addf %63, %67 : vector<14x256xf32>
    %c4_68 = arith.constant 4 : index
    %c0_69 = arith.constant 0 : index
    %69 = vector.load %arg17[%c4_68, %c0_69] : memref<18x108xf32, #tpu.memory_space<vmem>>, vector<14x108xf32>
    %c4_70 = arith.constant 4 : index
    %c0_71 = arith.constant 0 : index
    %c0_72 = arith.constant 0 : index
    %70 = vector.load %arg6[%c4_70, %c0_71, %c0_72] : memref<5x108x256xf32, #tpu.memory_space<vmem>>, vector<1x108x256xf32>
    %71 = vector.shape_cast %70 : vector<1x108x256xf32> to vector<108x256xf32>
    %cst_73 = arith.constant dense<0.000000e+00> : vector<14x256xf32>
    %72 = tpu.matmul %69, %71, %cst_73 {dimension_numbers = #tpu.dot_dimension_numbers<[1], [0], [0], [1], [0, 0, 1, 1], [], []>} : vector<14x108xf32>, vector<108x256xf32>, vector<14x256xf32> -> vector<14x256xf32>
    %73 = arith.addf %68, %72 : vector<14x256xf32>
    %c0_74 = arith.constant 0 : index
    %c0_75 = arith.constant 0 : index
    %74 = vector.load %arg7[%c0_74, %c0_75] : memref<1x256xf32, #tpu.memory_space<vmem>>, vector<1x256xf32>
    %75 = vector.broadcast %74 : vector<1x256xf32> to vector<14x256xf32>
    %76 = arith.addf %73, %75 : vector<14x256xf32>
    %cst_76 = arith.constant 0.000000e+00 : f32
    %77 = vector.broadcast %cst_76 : f32 to vector<14x256xf32>
    %78 = arith.maximumf %76, %77 : vector<14x256xf32>
    %79 = vector.extract_strided_slice %78 {offsets = [0, 0], sizes = [14, 128], strides = [1, 1]} : vector<14x256xf32> to vector<14x128xf32>
    %80 = vector.extract_strided_slice %78 {offsets = [0, 128], sizes = [14, 128], strides = [1, 1]} : vector<14x256xf32> to vector<14x128xf32>
    %81 = arith.maximumf %79, %80 : vector<14x128xf32>
    %c0_77 = arith.constant 0 : index
    %c0_78 = arith.constant 0 : index
    %82 = vector.load %arg8[%c0_77, %c0_78] : memref<7x14xf32, #tpu.memory_space<vmem>>, vector<7x14xf32>
    %cst_79 = arith.constant dense<0.000000e+00> : vector<7x128xf32>
    %83 = tpu.matmul %82, %81, %cst_79 {dimension_numbers = #tpu.dot_dimension_numbers<[1], [0], [0], [1], [0, 0, 1, 1], [], []>} : vector<7x14xf32>, vector<14x128xf32>, vector<7x128xf32> -> vector<7x128xf32>
    %c0_80 = arith.constant 0 : index
    %c0_81 = arith.constant 0 : index
    %84 = vector.load %arg9[%c0_80, %c0_81] : memref<7x14xf32, #tpu.memory_space<vmem>>, vector<7x14xf32>
    %cst_82 = arith.constant dense<0.000000e+00> : vector<7x128xf32>
    %85 = tpu.matmul %84, %81, %cst_82 {dimension_numbers = #tpu.dot_dimension_numbers<[1], [0], [0], [1], [0, 0, 1, 1], [], []>} : vector<7x14xf32>, vector<14x128xf32>, vector<7x128xf32> -> vector<7x128xf32>
    %86 = arith.maximumf %83, %85 : vector<7x128xf32>
    %c0_83 = arith.constant 0 : index
    %c0_84 = arith.constant 0 : index
    %87 = vector.load %arg11[%c0_83, %c0_84] : memref<1x128xf32, #tpu.memory_space<vmem>>, vector<1x128xf32>
    %88 = vector.extract_strided_slice %86 {offsets = [0, 0], sizes = [1, 128], strides = [1, 1]} : vector<7x128xf32> to vector<1x128xf32>
    %c0_85 = arith.constant 0 : index
    %c0_86 = arith.constant 0 : index
    %89 = vector.load %arg10[%c0_85, %c0_86] : memref<896x128xf32, #tpu.memory_space<vmem>>, vector<128x128xf32>
    %cst_87 = arith.constant dense<0.000000e+00> : vector<1x128xf32>
    %90 = tpu.matmul %88, %89, %cst_87 {dimension_numbers = #tpu.dot_dimension_numbers<[1], [0], [0], [1], [0, 0, 1, 1], [], []>} : vector<1x128xf32>, vector<128x128xf32>, vector<1x128xf32> -> vector<1x128xf32>
    %91 = arith.addf %87, %90 : vector<1x128xf32>
    %92 = vector.extract_strided_slice %86 {offsets = [1, 0], sizes = [1, 128], strides = [1, 1]} : vector<7x128xf32> to vector<1x128xf32>
    %c128 = arith.constant 128 : index
    %c0_88 = arith.constant 0 : index
    %93 = vector.load %arg10[%c128, %c0_88] : memref<896x128xf32, #tpu.memory_space<vmem>>, vector<128x128xf32>
    %cst_89 = arith.constant dense<0.000000e+00> : vector<1x128xf32>
    %94 = tpu.matmul %92, %93, %cst_89 {dimension_numbers = #tpu.dot_dimension_numbers<[1], [0], [0], [1], [0, 0, 1, 1], [], []>} : vector<1x128xf32>, vector<128x128xf32>, vector<1x128xf32> -> vector<1x128xf32>
    %95 = arith.addf %91, %94 : vector<1x128xf32>
    %96 = vector.extract_strided_slice %86 {offsets = [2, 0], sizes = [1, 128], strides = [1, 1]} : vector<7x128xf32> to vector<1x128xf32>
    %c256 = arith.constant 256 : index
    %c0_90 = arith.constant 0 : index
    %97 = vector.load %arg10[%c256, %c0_90] : memref<896x128xf32, #tpu.memory_space<vmem>>, vector<128x128xf32>
    %cst_91 = arith.constant dense<0.000000e+00> : vector<1x128xf32>
    %98 = tpu.matmul %96, %97, %cst_91 {dimension_numbers = #tpu.dot_dimension_numbers<[1], [0], [0], [1], [0, 0, 1, 1], [], []>} : vector<1x128xf32>, vector<128x128xf32>, vector<1x128xf32> -> vector<1x128xf32>
    %99 = arith.addf %95, %98 : vector<1x128xf32>
    %100 = vector.extract_strided_slice %86 {offsets = [3, 0], sizes = [1, 128], strides = [1, 1]} : vector<7x128xf32> to vector<1x128xf32>
    %c384 = arith.constant 384 : index
    %c0_92 = arith.constant 0 : index
    %101 = vector.load %arg10[%c384, %c0_92] : memref<896x128xf32, #tpu.memory_space<vmem>>, vector<128x128xf32>
    %cst_93 = arith.constant dense<0.000000e+00> : vector<1x128xf32>
    %102 = tpu.matmul %100, %101, %cst_93 {dimension_numbers = #tpu.dot_dimension_numbers<[1], [0], [0], [1], [0, 0, 1, 1], [], []>} : vector<1x128xf32>, vector<128x128xf32>, vector<1x128xf32> -> vector<1x128xf32>
    %103 = arith.addf %99, %102 : vector<1x128xf32>
    %104 = vector.extract_strided_slice %86 {offsets = [4, 0], sizes = [1, 128], strides = [1, 1]} : vector<7x128xf32> to vector<1x128xf32>
    %c512 = arith.constant 512 : index
    %c0_94 = arith.constant 0 : index
    %105 = vector.load %arg10[%c512, %c0_94] : memref<896x128xf32, #tpu.memory_space<vmem>>, vector<128x128xf32>
    %cst_95 = arith.constant dense<0.000000e+00> : vector<1x128xf32>
    %106 = tpu.matmul %104, %105, %cst_95 {dimension_numbers = #tpu.dot_dimension_numbers<[1], [0], [0], [1], [0, 0, 1, 1], [], []>} : vector<1x128xf32>, vector<128x128xf32>, vector<1x128xf32> -> vector<1x128xf32>
    %107 = arith.addf %103, %106 : vector<1x128xf32>
    %108 = vector.extract_strided_slice %86 {offsets = [5, 0], sizes = [1, 128], strides = [1, 1]} : vector<7x128xf32> to vector<1x128xf32>
    %c640 = arith.constant 640 : index
    %c0_96 = arith.constant 0 : index
    %109 = vector.load %arg10[%c640, %c0_96] : memref<896x128xf32, #tpu.memory_space<vmem>>, vector<128x128xf32>
    %cst_97 = arith.constant dense<0.000000e+00> : vector<1x128xf32>
    %110 = tpu.matmul %108, %109, %cst_97 {dimension_numbers = #tpu.dot_dimension_numbers<[1], [0], [0], [1], [0, 0, 1, 1], [], []>} : vector<1x128xf32>, vector<128x128xf32>, vector<1x128xf32> -> vector<1x128xf32>
    %111 = arith.addf %107, %110 : vector<1x128xf32>
    %112 = vector.extract_strided_slice %86 {offsets = [6, 0], sizes = [1, 128], strides = [1, 1]} : vector<7x128xf32> to vector<1x128xf32>
    %c768 = arith.constant 768 : index
    %c0_98 = arith.constant 0 : index
    %113 = vector.load %arg10[%c768, %c0_98] : memref<896x128xf32, #tpu.memory_space<vmem>>, vector<128x128xf32>
    %cst_99 = arith.constant dense<0.000000e+00> : vector<1x128xf32>
    %114 = tpu.matmul %112, %113, %cst_99 {dimension_numbers = #tpu.dot_dimension_numbers<[1], [0], [0], [1], [0, 0, 1, 1], [], []>} : vector<1x128xf32>, vector<128x128xf32>, vector<1x128xf32> -> vector<1x128xf32>
    %115 = arith.addf %111, %114 : vector<1x128xf32>
    %cst_100 = arith.constant 0.000000e+00 : f32
    %116 = vector.broadcast %cst_100 : f32 to vector<1x128xf32>
    %117 = arith.maximumf %115, %116 : vector<1x128xf32>
    %c0_101 = arith.constant 0 : index
    %c0_102 = arith.constant 0 : index
    %118 = vector.load %arg12[%c0_101, %c0_102] : memref<128x128xf32, #tpu.memory_space<vmem>>, vector<128x128xf32>
    %cst_103 = arith.constant dense<0.000000e+00> : vector<1x128xf32>
    %119 = tpu.matmul %117, %118, %cst_103 {dimension_numbers = #tpu.dot_dimension_numbers<[1], [0], [0], [1], [0, 0, 1, 1], [], []>} : vector<1x128xf32>, vector<128x128xf32>, vector<1x128xf32> -> vector<1x128xf32>
    %c0_104 = arith.constant 0 : index
    %c0_105 = arith.constant 0 : index
    %120 = vector.load %arg13[%c0_104, %c0_105] : memref<1x128xf32, #tpu.memory_space<vmem>>, vector<1x128xf32>
    %121 = arith.addf %119, %120 : vector<1x128xf32>
    %cst_106 = arith.constant 0.000000e+00 : f32
    %122 = vector.broadcast %cst_106 : f32 to vector<1x128xf32>
    %123 = arith.maximumf %121, %122 : vector<1x128xf32>
    %c0_107 = arith.constant 0 : index
    %c0_108 = arith.constant 0 : index
    %124 = vector.load %arg14[%c0_107, %c0_108] : memref<128x128xf32, #tpu.memory_space<vmem>>, vector<128x128xf32>
    %cst_109 = arith.constant dense<0.000000e+00> : vector<1x128xf32>
    %125 = tpu.matmul %123, %124, %cst_109 {dimension_numbers = #tpu.dot_dimension_numbers<[1], [0], [0], [1], [0, 0, 1, 1], [], []>} : vector<1x128xf32>, vector<128x128xf32>, vector<1x128xf32> -> vector<1x128xf32>
    %c0_110 = arith.constant 0 : index
    %c0_111 = arith.constant 0 : index
    %126 = vector.load %arg15[%c0_110, %c0_111] : memref<1x128xf32, #tpu.memory_space<vmem>>, vector<1x128xf32>
    %127 = arith.addf %125, %126 : vector<1x128xf32>
    %c0_112 = arith.constant 0 : index
    %c0_113 = arith.constant 0 : index
    %c0_114 = arith.constant 0 : index
    %128 = vector.load %arg16[%c0_112, %c0_113, %c0_114] : memref<1x1x128xf32, #tpu.memory_space<vmem>>, vector<1x1x128xf32>
    %129 = vector.shape_cast %128 : vector<1x1x128xf32> to vector<1x128xf32>
    %130 = vector.shape_cast %127 : vector<1x128xf32> to vector<1x1x128xf32>
    tpu.vector_store %arg16[%c0_112, %c0_113, %c0_114], %130 {strides = array<i32>} : memref<1x1x128xf32, #tpu.memory_space<vmem>>, vector<1x1x128xf32>,
    return
  }
  func.func @transform_0(%arg0: i32) -> (i32, i32, i32) {
    %c0_i32 = arith.constant 0 : i32
    %c0_i32_0 = arith.constant 0 : i32
    %c0_i32_1 = arith.constant 0 : i32
    return %arg0, %c0_i32, %c0_i32_0 : i32, i32, i32
  }
  func.func @transform_1(%arg0: i32) -> (i32, i32, i32) {
    %c0_i32 = arith.constant 0 : i32
    %c0_i32_0 = arith.constant 0 : i32
    %c0_i32_1 = arith.constant 0 : i32
    %c0_i32_2 = arith.constant 0 : i32
    return %c0_i32, %c0_i32_0, %c0_i32_1 : i32, i32, i32
  }
  func.func @transform_2(%arg0: i32) -> (i32, i32) {
    %c0_i32 = arith.constant 0 : i32
    %c0_i32_0 = arith.constant 0 : i32
    %c0_i32_1 = arith.constant 0 : i32
    return %c0_i32, %c0_i32_0 : i32, i32
  }
  func.func @transform_3(%arg0: i32) -> (i32, i32) {
    %c0_i32 = arith.constant 0 : i32
    %c0_i32_0 = arith.constant 0 : i32
    %c0_i32_1 = arith.constant 0 : i32
    return %c0_i32, %c0_i32_0 : i32, i32
  }
  func.func @transform_4(%arg0: i32) -> (i32, i32) {
    %c0_i32 = arith.constant 0 : i32
    %c0_i32_0 = arith.constant 0 : i32
    %c0_i32_1 = arith.constant 0 : i32
    return %c0_i32, %c0_i32_0 : i32, i32
  }
  func.func @transform_5(%arg0: i32) -> (i32, i32, i32) {
    %c0_i32 = arith.constant 0 : i32
    %c0_i32_0 = arith.constant 0 : i32
    %c0_i32_1 = arith.constant 0 : i32
    %c0_i32_2 = arith.constant 0 : i32
    return %c0_i32, %c0_i32_0, %c0_i32_1 : i32, i32, i32
  }
  func.func @transform_6(%arg0: i32) -> (i32, i32) {
    %c0_i32 = arith.constant 0 : i32
    %c0_i32_0 = arith.constant 0 : i32
    %c0_i32_1 = arith.constant 0 : i32
    return %c0_i32, %c0_i32_0 : i32, i32
  }
  func.func @transform_7(%arg0: i32) -> (i32, i32) {
    %c0_i32 = arith.constant 0 : i32
    %c0_i32_0 = arith.constant 0 : i32
    %c0_i32_1 = arith.constant 0 : i32
    return %c0_i32, %c0_i32_0 : i32, i32
  }
  func.func @transform_8(%arg0: i32) -> (i32, i32) {
    %c0_i32 = arith.constant 0 : i32
    %c0_i32_0 = arith.constant 0 : i32
    %c0_i32_1 = arith.constant 0 : i32
    return %c0_i32, %c0_i32_0 : i32, i32
  }
  func.func @transform_9(%arg0: i32) -> (i32, i32) {
    %c0_i32 = arith.constant 0 : i32
    %c0_i32_0 = arith.constant 0 : i32
    %c0_i32_1 = arith.constant 0 : i32
    return %c0_i32, %c0_i32_0 : i32, i32
  }
  func.func @transform_10(%arg0: i32) -> (i32, i32) {
    %c0_i32 = arith.constant 0 : i32
    %c0_i32_0 = arith.constant 0 : i32
    %c0_i32_1 = arith.constant 0 : i32
    return %c0_i32, %c0_i32_0 : i32, i32
  }
  func.func @transform_11(%arg0: i32) -> (i32, i32) {
    %c0_i32 = arith.constant 0 : i32
    %c0_i32_0 = arith.constant 0 : i32
    %c0_i32_1 = arith.constant 0 : i32
    return %c0_i32, %c0_i32_0 : i32, i32
  }
  func.func @transform_12(%arg0: i32) -> (i32, i32) {
    %c0_i32 = arith.constant 0 : i32
    %c0_i32_0 = arith.constant 0 : i32
    %c0_i32_1 = arith.constant 0 : i32
    return %c0_i32, %c0_i32_0 : i32, i32
  }
  func.func @transform_13(%arg0: i32) -> (i32, i32) {
    %c0_i32 = arith.constant 0 : i32
    %c0_i32_0 = arith.constant 0 : i32
    %c0_i32_1 = arith.constant 0 : i32
    return %c0_i32, %c0_i32_0 : i32, i32
  }
  func.func @transform_14(%arg0: i32) -> (i32, i32) {
    %c0_i32 = arith.constant 0 : i32
    %c0_i32_0 = arith.constant 0 : i32
    %c0_i32_1 = arith.constant 0 : i32
    return %c0_i32, %c0_i32_0 : i32, i32
  }
  func.func @transform_15(%arg0: i32) -> (i32, i32, i32) {
    %c0_i32 = arith.constant 0 : i32
    %c0_i32_0 = arith.constant 0 : i32
    %c0_i32_1 = arith.constant 0 : i32
    return %arg0, %c0_i32, %c0_i32_0 : i32, i32, i32
  }
}

</mosaic_0001>

<bundles_post_ra>
// kernel: lenet_forward.1
= control target key start
LH: loop header
LB: loop body
LE: loop exit
PB: predicated region body
PF: predicated region fallthrough
CT: control target
= control target key end

     0   :  { %s3284_s0 = inlined_call_operand.vmem [shape: f32[2,32,32], index: 0, kind: input, shape index: {}]   ;;  %s3285_s1 = inlined_call_operand.vmem [shape: f32[5,32,256], index: 1, kind: input, shape index: {}]   ;;  %s3286_s2 = inlined_call_operand.vmem [shape: f32[1,256], index: 2, kind: input, shape index: {}]   ;;  %s3287_s3 = inlined_call_operand.vmem [shape: f32[14,28], index: 3, kind: input, shape index: {}]   ;;  %s3288_s4 = inlined_call_operand.vmem [shape: f32[14,28], index: 4, kind: input, shape index: {}]   ;;  %s3289_s5 = inlined_call_operand.hbm [shape: f32[5,108,256], index: 5, kind: input, shape index: {}]   ;;  %s3290_s6 = inlined_call_operand.hbm [shape: f32[1,256], index: 6, kind: input, shape index: {}]   ;;  %s3291_s7 = inlined_call_operand.vmem [shape: f32[7,14], index: 7, kind: input, shape index: {}]   ;;  %s3292_s8 = inlined_call_operand.vmem [shape: f32[7,14], index: 8, kind: input, shape index: {}]   ;;  %s3293_s9 = inlined_call_operand.hbm [shape: f32[896,128], index: 9, kind: input, shape index: {}]   ;;  %s3294_s10 = inlined_call_operand.hbm [shape: f32[1,128], index: 10, kind: input, shape index: {}]   ;;  %s3295_s11 = inlined_call_operand.hbm [shape: f32[128,128], index: 11, kind: input, shape index: {}]   ;;  %s3296_s12 = inlined_call_operand.hbm [shape: f32[1,128], index: 12, kind: input, shape index: {}]   ;;  %s3297_s13 = inlined_call_operand.hbm [shape: f32[128,128], index: 13, kind: input, shape index: {}]   ;;  %s3298_s14 = inlined_call_operand.hbm [shape: f32[1,128], index: 14, kind: input, shape index: {}]   ;;  %s3299_s15 = inlined_call_operand.hbm [shape: f32[2,1,128], index: 15, kind: output, shape index: {}]  }
   0x1   :  { %3308 = sst [smem:[#allocation31_spill]] %s3289_s5 }
   0x2   :  { %3309 = sst [smem:[#allocation32_spill]] %s3290_s6 }
   0x3   :  { %3310 = sst [smem:[#allocation33_spill]] %s3293_s9 }
   0x4   :  { %3311 = sst [smem:[#allocation34_spill]] %s3294_s10 }
   0x5   :  { %20 = vsyncpa [#allocation4], 0 }
   0x6   :  { %21 = vsyncpa [#allocation7], 0 }
   0x7   :  { %22 = vsyncpa [#allocation10], 0 }
   0x8   :  { %23 = vsyncpa [#allocation13], 0 }
   0x9   :  { %24 = vsyncpa [#allocation16], 0 }
   0xa   :  { %25 = vsyncpa [#allocation5], 0 }
   0xb   :  { %27 = vsyncpa [#allocation5 + $0x1], 0  ;;  %s2876_s18 = smov 0   ;;  %s2878_s19 = smov 0  }
   0xc   :  { %s2880_s20 = smov 0   ;;  %s2882_s21 = smov 0  }
   0xd LB: > { %3312 = sst [smem:[#allocation24_spill]] %s2768_s18  ;;  %s2897_s22 = sadd.s32 4294967295, %s2780_s21   ;;  %s2780_s21 = sphi %s2882_s21, %s3331_s21   ;;  %s2776_s20 = sphi %s2880_s20, %s3333_s20   ;;  %s2772_s19 = sphi %s2878_s19, %s3335_s19   ;;  %s2768_s18 = sphi %s2876_s18, %s3334_s18  }
   0xe   : > { %3313 = sst [smem:[#allocation25_spill]] %s2776_s20  ;;  %s2191_s23 = sadd.s32 4294967294, %s2780_s21  }
   0xf   : > { %3314 = sst [smem:[#allocation26_spill]] %s2780_s21  ;;  %s2901_s24 = sadd.s32 1, %s2780_s21  }
  0x10   : > { %3315 = sst [smem:[#allocation27_spill]] %s2901_s24  ;;  %s360_s25 = sadd.s32 1, %s2776_s20 }
  0x11   : > { %s357_s26 = ssub.s32 %s2780_s21, %s2901_s24  ;;  %p370_p0 = scmp.ne.s32.totalorder %s2776_s20, %s2772_s19 }
  0x12   : > { %p358_p1 = scmp.eq.s32.totalorder %s357_s26, 0  ;;  %p371_p2 = scmp.eq.s32.totalorder %s2897_s22, 1 }
  0x13   : > { %p376_p3 = scmp.ne.s32.totalorder %s2772_s19, %s2768_s18  ;;  %p377_p4 = scmp.eq.s32.totalorder %s2191_s23, 1 }
  0x14   : > { %s2912_s27 = scalar_select %p358_p1, %s2776_s20, %s360_s25  }
  0x15   : > { %p2914_p5 = por %p371_p2, %p370_p0  ;;  %p2918_p6 = por %p377_p4, %p376_p3 }
  0x16   : > { %3316 = sst [smem:[#allocation28_spill]] %s2912_s27  ;;  %p2192_p7 = scmp.ge.s32.totalorder %s2780_s21, 1 }
  0x17   : > { %s3317_s28 = scalar_select %p2914_p5, 1, 0 }
  0x18   : > { %s3319_s29 = scalar_select %p2918_p6, 1, 0 }
  0x19   : > { %3318 = sst [smem:[#allocation29_spill]] %s3317_s28  ;;  %p384_p8 = scmp.lt.s32.totalorder %s2780_s21, 3 }
  0x1a   : > { %3320 = sst [smem:[#allocation30_spill]] %s3319_s29  ;;  %p2395_p9 = scmp.eq.s32.totalorder %s2897_s22, 0 }
  0x1b   : > { %p2925_p10 = pnand %p2192_p7, %p384_p8  ;;  %s3322_s6 = sld [smem:[#allocation32_spill]] }
  0x1c   : > { %s2782_s25 = smov [#allocation6]   ;;  %s3323_s10 = sld [smem:[#allocation34_spill]] }
  0x1d   : > { %p2366_p11 = pneg %p2925_p10  ;;  %s424_s26 = sshll.u32 %s2782_s25, 4  ;;  %s425_s26 = int_to_ptr.vmem [resolvable:$true] %s424_s26 }
  0x1e   : > { %s2783_s18 = smov [#allocation9]   ;;  %s3325_s5 = sld [smem:[#allocation31_spill]] }
  0x1f   : > { %p2939_p12 = pnand %p2395_p9, %p2366_p11  ;;  %s456_s25 = sshll.u32 %s2783_s18, 4  ;;  %s457_s25 = int_to_ptr.vmem [resolvable:$true] %s456_s25 }
  0x20   : > { %s2784_s21 = smov [#allocation12]   ;;  %s2785_s16 = smov [#allocation3]  }
  0x21   : > { %s422_s23 = sshll.u32 %s3322_s6, 4  ;;  %s480_s6 = sshll.u32 %s3296_s12, 4  ;;  %s423_s23 = int_to_ptr.hbm [resolvable:$true] %s422_s23  ;;  %s481_s6 = int_to_ptr.hbm [resolvable:$true] %s480_s6 }
  0x22   : > { %s454_s24 = sshll.u32 %s3323_s10, 4  ;;  %s482_s28 = sshll.u32 %s2784_s21, 4  ;;  %s455_s24 = int_to_ptr.hbm [resolvable:$true] %s454_s24  ;;  %s483_s28 = int_to_ptr.vmem [resolvable:$true] %s482_s28 }
  0x23   : > { %2372 = dma.hbm_to_vmem [thread:$0]  (!%p2939_p12), %s423_s23, 32, %s425_s26, [#allocation7]  }
  0x24   : > { %2378 = dma.hbm_to_vmem [thread:$0]  (!%p2939_p12), %s455_s24, 16, %s457_s25, [#allocation10]  }
  0x25   : > { %s407_s10 = sshll.u32 %s3325_s5, 4  ;;  %s409_s18 = sshll.u32 %s2785_s16, 4  ;;  %s408_s10 = int_to_ptr.hbm [resolvable:$true] %s407_s10  ;;  %s410_s18 = int_to_ptr.vmem [resolvable:$true] %s409_s18 }
  0x26   : > { %2384 = dma.hbm_to_vmem [thread:$0]  (!%p2939_p12), %s481_s6, 16, %s483_s28, [#allocation13]  }
  0x27   : > { %s2786_s17 = smov 256   ;;  %s2787_s23 = smov 16  }
  0x28   : > { %2369 = dma.hbm_to_vmem [thread:$0]  (!%p2939_p12), %s408_s10, 17920, %s410_s18, [#allocation4], %s2786_s17, %s2786_s17, %s2787_s23  }
  0x29   : > { %s3326_s9 = sld [smem:[#allocation33_spill]]  ;;  %s2788_s20 = smov [#allocation8]  }
  0x2a   : > { %s441_s21 = sshll.u32 %s2788_s20, 4  ;;  %s465_s6 = sshll.u32 %s3295_s11, 4  ;;  %s442_s21 = int_to_ptr.vmem [resolvable:$true] %s441_s21  ;;  %s466_s6 = int_to_ptr.hbm [resolvable:$true] %s465_s6 }
  0x2b   : > { %s2789_s28 = smov 128   ;;  %s2790_s16 = smov 8  }
  0x2c   : > { %s2791_s10 = smov [#allocation11]   ;;  %s491_s26 = sshll.u32 %s3297_s13, 4  ;;  %s492_s26 = int_to_ptr.hbm [resolvable:$true] %s491_s26 }
  0x2d   : > { %s467_s18 = sshll.u32 %s2791_s10, 4  ;;  %s506_s20 = sshll.u32 %s3298_s14, 4  ;;  %s468_s18 = int_to_ptr.vmem [resolvable:$true] %s467_s18  ;;  %s507_s20 = int_to_ptr.hbm [resolvable:$true] %s506_s20 }
  0x2e   : > { %2381 = dma.hbm_to_vmem [thread:$0]  (!%p2939_p12), %s466_s6, 2048, %s468_s18, [#allocation10], %s2789_s28, %s2789_s28, %s2790_s16  }
  0x2f   : > { %s439_s25 = sshll.u32 %s3326_s9, 4  ;;  %s2792_s27 = smov [#allocation14]   ;;  %s440_s25 = int_to_ptr.hbm [resolvable:$true] %s439_s25 }
  0x30   : > { %2375 = dma.hbm_to_vmem [thread:$0]  (!%p2939_p12), %s440_s25, 14336, %s442_s21, [#allocation7], %s2789_s28, %s2789_s28, %s2790_s16  }
  0x31   : > { %s493_s9 = sshll.u32 %s2792_s27, 4  ;;  %s2793_s25 = smov [#allocation15]   ;;  %s494_s9 = int_to_ptr.vmem [resolvable:$true] %s493_s9 }
  0x32   : > { %2387 = dma.hbm_to_vmem [thread:$0]  (!%p2939_p12), %s492_s26, 2048, %s494_s9, [#allocation13], %s2789_s28, %s2789_s28, %s2790_s16  }
  0x33   : > { %s508_s21 = sshll.u32 %s2793_s25, 4  ;;  %529 = sbr.rel (%p2925_p10) target bundleno = 1302 (0x516), region = 80  ;;  %s509_s21 = int_to_ptr.vmem [resolvable:$true] %s508_s21 }
  0x34   : > { %2390 = dma.hbm_to_vmem [thread:$0]  (!%p2939_p12), %s507_s20, 16, %s509_s21, [#allocation16]  }
  0x38   : > { %2743 = dma.done.wait (%p2395_p9), [#allocation4], 17920  }
  0x39   : > { %2745 = vsyncadd (%p2395_p9), [#allocation4], 4294949376 }
  0x3a   : > { %2747 = dma.done.wait (%p2395_p9), [#allocation7], 14368  }
  0x3b   : > { %2749 = vsyncadd (%p2395_p9), [#allocation7], 4294952928 }
  0x3c   : > { %2751 = dma.done.wait (%p2395_p9), [#allocation10], 2064  }
  0x3d   : > { %2753 = vsyncadd (%p2395_p9), [#allocation10], 4294965232 }
  0x3e   : > { %2755 = dma.done.wait (%p2395_p9), [#allocation13], 2064  }
  0x3f   : > { %2757 = vsyncadd (%p2395_p9), [#allocation13], 4294965232 }
  0x40   : > { %2759 = dma.done.wait (%p2395_p9), [#allocation16], 16  }
  0x41   : > { %2761 = vsyncadd (%p2395_p9), [#allocation16], 4294967280  ;;  %p612_p13 = scmp.lt.s32.totalorder %s2897_s22, 1  ;;  %v2219_v0 = vld [vmem:[%s3285_s1 + $0x70] sm:$0xff]  ;;  %v2217_v2 = vld [vmem:[%s3285_s1 + $0x60] sm:$0xff]  ;;  %vm642_vm0 = vcmask 261120   ;;  %s2053_s16 = scalar_lea.hbm %s3299_s15, %s2897_s22 }
  0x42   : > { %v627_v1 = vld [vmem:[%s3285_s1 + $0x30] sm:$0xff]  ;;  %667 = vmatpush.msra.mxu0 %v2219_v0  ;;  %2328 = vmatpush.msra.mxu1 %v2219_v0  ;;  %v625_v3 = vld [vmem:[%s3285_s1 + $0x20] sm:$0xff]  ;;  %v628_v6 = vld [vmem:[%s3285_s1 + $0x38] sm:$0xff]  ;;  %vm1091_vm1 = vcmask 1043456   ;;  %vm1084_vm2 = vcmask 228352   ;;  %vm1151_vm3 = vcmask 883712  }
  0x43   : > { %s613_s9 = scalar_select %p612_p13, %s2897_s22, 1  ;;  %737 = vmatpush.msra.mxu2 %v627_v1  ;;  %v2215_v4 = vld [vmem:[%s3285_s1 + $0x50] sm:$0xff]  ;;  %v2213_v7 = vld [vmem:[%s3285_s1 + $0x40] sm:$0xff]  ;;  %766 = vmatpush.msra.mxu3 %v628_v6  ;;  %v626_v8 = vld [vmem:[%s3285_s1 + $0x28] sm:$0xff]  ;;  %vm1154_vm4 = vcmask 877568   ;;  %vm1164_vm5 = vcmask 785504  }
  0x44   : > { %668 = vmatpush.msra.mxu0 %v2217_v2  ;;  %2329 = vmatpush.msra.mxu1 %v2217_v2  ;;  %v623_v5 = vld [vmem:[%s3285_s1 + $0x10] sm:$0xff]  ;;  %v621_v9 = vld [vmem:[%s3285_s1] sm:$0xff]  ;;  %v624_v13 = vld [vmem:[%s3285_s1 + $0x18] sm:$0xff]  ;;  %s2795_s20 = smov 12   ;;  %vm1166_vm6 = vcmask 783456   ;;  %vm1645_vm7 = vcmask 1045504  }
  0x45   : > { %s2327_s29 = sshll.u32 %s613_s9, 5  ;;  %738 = vmatpush.msra.mxu2 %v625_v3  ;;  %767 = vmatpush.msra.mxu3 %v626_v8  ;;  %v2220_v14 = vld [vmem:[%s3285_s1 + $0x78] sm:$0xff]  ;;  %v2243_v15 = vld [vmem:[%s3285_s1 + $0xb0] sm:$0xff]  ;;  %v622_v16 = vld [vmem:[%s3285_s1 + $0x8] sm:$0xff]  ;;  %vm1641_vm8 = vcmask 113664   ;;  %s610_s6 = sand.u32 1, %s2772_s19  }
  0x46   : > { %s3019_s27 = scalar_lea.vmem %s3284_s0, %s2327_s29  ;;  %669 = vmatpush.msra.mxu0 %v2215_v4  ;;  %2330 = vmatpush.msra.mxu1 %v2215_v4  ;;  %v2218_v17 = vld [vmem:[%s3285_s1 + $0x68] sm:$0xff]  ;;  %v2241_v18 = vld [vmem:[%s3285_s1 + $0xa0] sm:$0xff]  ;;  %v2259_v19 = vld [vmem:[%s3285_s1 + $0xf0] sm:$0xff]  ;;  %s611_s10 = scalar_lea.vmem [#allocation17], %s610_s6 }
  0x47   : > { %v3037_v10 = vld [vmem:[%s3019_s27 + $0x1] sm:$0xff]  ;;  %739 = vmatpush.msra.mxu2 %v623_v5  ;;  %v3040_v11 = vld [vmem:[%s3019_s27 + $0x11] sm:$0xff]  ;;  %768 = vmatpush.msra.mxu3 %v624_v13  ;;  %v630_v24 = vld [vmem:[%s3019_s27 + $0x9] sm:$0xff]  ;;  %s2055_s18 = sshll.u32 %s611_s10, 4  ;;  %s2057_s17 = sshll.u32 %s2053_s16, 4  ;;  %s2056_s18 = int_to_ptr.vmem [resolvable:$true] %s2055_s18  ;;  %s2058_s17 = int_to_ptr.hbm [resolvable:$true] %s2057_s17 }
  0x48   : > { %v617_v12 = vld [vmem:[%s3019_s27] sm:$0xff]  ;;  %670 = vmatpush.msra.mxu0 %v2213_v7  ;;  %2331 = vmatpush.msra.mxu1 %v2213_v7  ;;  %v2216_v20 = vld [vmem:[%s3285_s1 + $0x58] sm:$0xff]  ;;  %v2239_v22 = vld [vmem:[%s3285_s1 + $0x90] sm:$0xff]  ;;  %s2045_s23 = scalar_lea.sflag [#allocation5], %s610_s6  ;;  %s2712_s26 = sshra.s32 %s2058_s17, 4  ;;  %s2713_s26 = int_to_ptr.hbm [resolvable:$true] %s2712_s26 }
  0x49   : > { %740 = vmatpush.msra.mxu2 %v621_v9  ;;  %2221 = vmatmul.msk.f32.vlgmr.msra.gmra.mxu0 %vm642_vm0, %v3037_v10  ;;  %v2257_v21 = vld [vmem:[%s3285_s1 + $0xe0] sm:$0xff]  ;;  %v2260_v23 = vld [vmem:[%s3285_s1 + $0xf8] sm:$0xff]  ;;  %v2214_v25 = vld [vmem:[%s3285_s1 + $0x48] sm:$0xff]  ;;  %s2714_s24 = scalar_lea.hbm %s2713_s26, 1  ;;  %s2718_s22 = scalar_lea.hbm %s3299_s15, 2 }
  0x4a   : > { %2223 = vmatmul.msk.f32.vlgmr.msra.gmra.mxu1 %vm642_vm0, %v3040_v11  ;;  %2229 = vmatmul.msk.f32.vlgmr.msra.gmra.mxu2 %vm642_vm0, %v617_v12  ;;  %v632_v26 = vld [vmem:[%s3019_s27 + $0x19] sm:$0xf]  ;;  %v618_v27 = vld [vmem:[%s3019_s27 + $0x8] sm:$0xff]  ;;  %v2237_v28 = vld [vmem:[%s3285_s1 + $0x80] sm:$0xff]  ;;  %p2715_p0 = scmp.ne.s32.totalorder %s2713_s26, %s2714_s24  ;;  %p2719_p3 = scmp.lt.s32.totalorder %s2713_s26, %s3299_s15 }
  0x4b   : > { %696 = vmatpush.msrb.mxu1 %v2220_v14  ;;  %820 = vmatpush.msrb.mxu0 %v2243_v15  ;;  %v2255_v29 = vld [vmem:[%s3285_s1 + $0xd0] sm:$0xff]  ;;  %v2258_v30 = vld [vmem:[%s3285_s1 + $0xe8] sm:$0xff]  ;;  %v2253_v31 = vld [vmem:[%s3285_s1 + $0xc0] sm:$0xff]  ;;  %p2720_p4 = scmp.lt.s32.totalorder %s2718_s22, %s2714_s24 }
  0x4c   : > { %911 = vmatpush.msrb.mxu2 %v2259_v19  ;;  %769 = vmatpush.msra.mxu3 %v622_v16  ;;  %v2244_v32 = vld [vmem:[%s3285_s1 + $0xb8] sm:$0xff]  ;;  %v2275_v33 = vld [vmem:[%s3285_s1 + $0x130] sm:$0xff]  ;;  %v2242_v34 = vld [vmem:[%s3285_s1 + $0xa8] sm:$0xff]  ;;  %p2716_p1 = pnand %p2715_p0, %p2914_p5 }
  0x4d   : > { %697 = vmatpush.msrb.mxu1 %v2218_v17  ;;  %2233 = vmatmul.msk.f32.vlgmr.msra.gmra.mxu3 %vm642_vm0, %v617_v12  ;;  %v2256_v35 = vld [vmem:[%s3285_s1 + $0xd8] sm:$0xff]  ;;  %v2273_v36 = vld [vmem:[%s3285_s1 + $0x120] sm:$0xff]  ;;  %v2254_v39 = vld [vmem:[%s3285_s1 + $0xc8] sm:$0xff]  ;;  %p2721_p7 = por %p2720_p4, %p2719_p3 }
  0x4e   : > { %821 = vmatpush.msrb.mxu0 %v2241_v18  ;;  %912 = vmatpush.msrb.mxu2 %v2257_v21  ;;  %v2240_v37 = vld [vmem:[%s3285_s1 + $0x98] sm:$0xff]  ;;  %v783_v38 = vld [vmem:[%s3019_s27 + $0x2] sm:$0xff]  ;;  %v619_v40 = vld [vmem:[%s3019_s27 + $0x10] sm:$0xff]  ;;  %p2717_p2 = pneg %p2716_p1 }
  0x4f   : > { %698 = vmatpush.msrb.mxu1 %v2216_v20  ;;  %940 = vmatpush.msrb.mxu3 %v2260_v23  ;;  %v2271_v41 = vld [vmem:[%s3285_s1 + $0x110] sm:$0xff]  ;;  %v2238_v42 = vld [vmem:[%s3285_s1 + $0x88] sm:$0xff]  ;;  %v2269_v43 = vld [vmem:[%s3285_s1 + $0x100] sm:$0xff] }
  0x50   : > { %822 = vmatpush.msrb.mxu0 %v2239_v22  ;;  %913 = vmatpush.msrb.mxu2 %v2255_v29  ;;  %v784_v44 = vld [vmem:[%s3019_s27 + $0xa] sm:$0xff]  ;;  %v620_v45 = vld [vmem:[%s3019_s27 + $0x18] sm:$0xf]  ;;  %v968_v59 = vld [vmem:[%s3019_s27 + $0x1c] sm:$0xf]  ;;  %p2722_p8 = pnand %p2721_p7, %p2717_p2 }
  0x51   : > { %2222 = vmatmul.msk.f32.gmra.mxu0 %vm642_vm0, %v630_v24  ;;  %699 = vmatpush.msrb.mxu1 %v2214_v25  ;;  %v785_v46 = vld [vmem:[%s3019_s27 + $0x12] sm:$0xff]  ;;  %v874_v47 = vld [vmem:[%s3019_s27 + $0x3] sm:$0xff]  ;;  %v786_v48 = vld [vmem:[%s3019_s27 + $0x1a] sm:$0xf] }
  0x52   : > { %2224 = vmatmul.msk.f32.gmra.mxu1 %vm642_vm0, %v632_v26  ;;  %2230 = vmatmul.msk.f32.gmra.mxu2 %vm642_vm0, %v618_v27  ;;  %v875_v49 = vld [vmem:[%s3019_s27 + $0xb] sm:$0xff]  ;;  %v2276_v50 = vld [vmem:[%s3285_s1 + $0x138] sm:$0xff] }
  0x53   : > { %823 = vmatpush.msrb.mxu0 %v2237_v28  ;;  %941 = vmatpush.msrb.mxu3 %v2258_v30  ;;  %v2274_v51 = vld [vmem:[%s3285_s1 + $0x128] sm:$0xff]  ;;  %v2272_v52 = vld [vmem:[%s3285_s1 + $0x118] sm:$0xff] }
  0x54   : > { %849 = vmatpush.msra.mxu1 %v2244_v32  ;;  %914 = vmatpush.msrb.mxu2 %v2253_v31  ;;  %v965_v53 = vld [vmem:[%s3019_s27 + $0x4] sm:$0xff]  ;;  %v876_v55 = vld [vmem:[%s3019_s27 + $0x13] sm:$0xff]  ;;  %v877_v57 = vld [vmem:[%s3019_s27 + $0x1b] sm:$0xf] }
  0x55   : > { %1002 = vmatpush.msra.mxu0 %v2275_v33  ;;  %2234 = vmatmul.msk.f32.gmra.mxu3 %vm642_vm0, %v618_v27  ;;  %v2270_v54 = vld [vmem:[%s3285_s1 + $0x108] sm:$0xff]  ;;  %v967_v58 = vld [vmem:[%s3019_s27 + $0x14] sm:$0xff] }
  0x56   : > { %850 = vmatpush.msra.mxu1 %v2242_v34  ;;  %942 = vmatpush.msrb.mxu3 %v2256_v35  ;;  %v966_v56 = vld [vmem:[%s3019_s27 + $0xc] sm:$0xff] }
  0x57   : > { %1003 = vmatpush.msra.mxu0 %v2273_v36 }
  0x58   : > { %851 = vmatpush.msra.mxu1 %v2240_v37  ;;  %943 = vmatpush.msrb.mxu3 %v2254_v39 }
  0x59   : > { %2245 = vmatmul.msk.f32.vlgmr.msrb.gmra.mxu0 %vm642_vm0, %v783_v38 }
  0x5a   : > { %2225 = vmatmul.msk.f32.vlgmr.msrb.gmra.mxu1 %vm642_vm0, %v3037_v10  ;;  %2231 = vmatmul.msk.f32.gmra.mxu2 %vm642_vm0, %v619_v40 }
  0x5b   : > { %1004 = vmatpush.msra.mxu0 %v2271_v41  ;;  %852 = vmatpush.msra.mxu1 %v2238_v42 }
  0x5d   : > { %1005 = vmatpush.msra.mxu0 %v2269_v43  ;;  %2235 = vmatmul.msk.f32.gmra.mxu3 %vm642_vm0, %v619_v40 }
  0x5e   : > { %1031 = vmatpush.msrb.mxu1 %v2276_v50 }
  0x60   : > { %1032 = vmatpush.msrb.mxu1 %v2274_v51 }
  0x61   : > { %2246 = vmatmul.msk.f32.gmra.mxu0 %vm642_vm0, %v784_v44 }
  0x62   : > { %2226 = vmatmul.msk.f32.gmra.mxu1 %vm642_vm0, %v630_v24  ;;  %2232 = vmatmul.msk.f32.gmra.mxu2 %vm642_vm0, %v620_v45 }
  0x63   : > { %1033 = vmatpush.msrb.mxu1 %v2272_v52 }
  0x65   : > { %2236 = vmatmul.msk.f32.gmra.mxu3 %vm642_vm0, %v620_v45  ;;  %1034 = vmatpush.msrb.mxu1 %v2270_v54 }
  0x69   : > { %2247 = vmatmul.msk.f32.gmra.mxu0 %vm642_vm0, %v785_v46 }
  0x6a   : > { %2227 = vmatmul.msk.f32.gmra.mxu1 %vm642_vm0, %v3040_v11  ;;  %2261 = vmatmul.msk.f32.vlgmr.msrb.gmra.mxu2 %vm642_vm0, %v874_v47 }
  0x6d   : > { %2265 = vmatmul.msk.f32.vlgmr.msrb.gmra.mxu3 %vm642_vm0, %v874_v47 }
  0x71   : > { %2248 = vmatmul.msk.f32.gmra.mxu0 %vm642_vm0, %v786_v48 }
  0x72   : > { %2228 = vmatmul.msk.f32.gmra.mxu1 %vm642_vm0, %v632_v26  ;;  %2262 = vmatmul.msk.f32.gmra.mxu2 %vm642_vm0, %v875_v49  ;;  %v1056_v26 = vld [vmem:[%s3286_s2] sm:$0x3] }
  0x73   : > { %v1058_v31 = vperm.slane %v1056_v26, 0  ;;  %v1059_v34 = vperm.slane %v1056_v26, 1 }
  0x75   : > { %2266 = vmatmul.msk.f32.gmra.mxu3 %vm642_vm0, %v875_v49 }
  0x79   : > { %2277 = vmatmul.msk.f32.vlgmr.msra.gmra.mxu0 %vm642_vm0, %v965_v53 }
  0x7a   : > { %2249 = vmatmul.msk.f32.vlgmr.msra.gmra.mxu1 %vm642_vm0, %v783_v38  ;;  %2263 = vmatmul.msk.f32.gmra.mxu2 %vm642_vm0, %v876_v55 }
  0x7d   : > { %2267 = vmatmul.msk.f32.gmra.mxu3 %vm642_vm0, %v876_v55 }
  0x81   : > { %2278 = vmatmul.msk.f32.gmra.mxu0 %vm642_vm0, %v966_v56 }
  0x82   : > { %2250 = vmatmul.msk.f32.gmra.mxu1 %vm642_vm0, %v784_v44  ;;  %2264 = vmatmul.msk.f32.gmra.mxu2 %vm642_vm0, %v877_v57 }
  0x85   : > { %2268 = vmatmul.msk.f32.gmra.mxu3 %vm642_vm0, %v877_v57 }
  0x89   : > { %2279 = vmatmul.msk.f32.gmra.mxu0 %vm642_vm0, %v967_v58 }
  0x8a   : > { %2251 = vmatmul.msk.f32.gmra.mxu1 %vm642_vm0, %v785_v46 }
  0x91   : > { %2280 = vmatmul.msk.f32.gmra.mxu0 %vm642_vm0, %v968_v59 }
  0x92   : > { %2252 = vmatmul.msk.f32.gmra.mxu1 %vm642_vm0, %v786_v48 }
  0x9a   : > { %2281 = vmatmul.msk.f32.vlgmr.msrb.gmra.mxu1 %vm642_vm0, %v965_v53 }
  0xa2   : > { %2282 = vmatmul.msk.f32.gmra.mxu1 %vm642_vm0, %v966_v56 }
  0xaa   : > { %2283 = vmatmul.msk.f32.gmra.mxu1 %vm642_vm0, %v967_v58 }
  0xb2   : > { %2284 = vmatmul.msk.f32.gmra.mxu1 %vm642_vm0, %v968_v59 }
  0xc6   : > { %v672_v61 = vpop.f32.mrf.mxu0 }
  0xc7   : > { %v678_v60 = vpop.f32.mrf.mxu1 }
  0xcd   : > { %v742_v2 = vpop.f32.mrf.mxu2 }
  0xce   : > { %v675_v0 = vpop.f32.mrf.mxu0  ;;  %v743_v21 = vadd.f32 %v742_v2, %v672_v61 }
  0xcf   : > { %v681_v62 = vpop.f32.mrf.mxu1 }
  0xd0   : > { %v771_v4 = vpop.f32.mrf.mxu3 }
  0xd5   : > { %v745_v6 = vpop.f32.mrf.mxu2 }
  0xd6   : > { %v825_v3 = vpop.f32.mrf.mxu0  ;;  %v746_v56 = vadd.f32 %v745_v6, %v675_v0 }
  0xd7   : > { %v701_v63 = vpop.f32.mrf.mxu1  ;;  %v866_v25 = vadd.f32 %v825_v3, %v743_v21 }
  0xd8   : > { %v774_v9 = vpop.f32.mrf.mxu3  ;;  %v772_v24 = vadd.f32 %v771_v4, %v701_v63 }
  0xdd   : > { %v748_v10 = vpop.f32.mrf.mxu2 }
  0xde   : > { %v828_v7 = vpop.f32.mrf.mxu0  ;;  %v749_v43 = vadd.f32 %v748_v10, %v678_v60 }
  0xdf   : > { %v704_v1 = vpop.f32.mrf.mxu1 }
  0xe0   : > { %v777_v13 = vpop.f32.mrf.mxu3  ;;  %v775_v54 = vadd.f32 %v774_v9, %v704_v1 }
  0xe5   : > { %v751_v14 = vpop.f32.mrf.mxu2 }
  0xe6   : > { %v831_v11 = vpop.f32.mrf.mxu0  ;;  %v752_v53 = vadd.f32 %v751_v14, %v681_v62 }
  0xe7   : > { %v707_v5 = vpop.f32.mrf.mxu1  ;;  %v870_v48 = vadd.f32 %v831_v11, %v749_v43  ;;  %v868_v11 = vadd.f32 %v828_v7, %v746_v56  ;;  %v1219_v43 = vld [vmem:[#allocation3 + $0x170] sm:$0xff]  ;;  %v1213_v56 = vld [vmem:[#allocation3 + $0x140] sm:$0xff] }
  0xe8   : > { %v780_v17 = vpop.f32.mrf.mxu3  ;;  %v778_v47 = vadd.f32 %v777_v13, %v707_v5 }
  0xed   : > { %v916_v19 = vpop.f32.mrf.mxu2 }
  0xee   : > { %v834_v16 = vpop.f32.mrf.mxu0  ;;  %v957_v27 = vadd.f32 %v916_v19, %v866_v25 }
  0xef   : > { %v710_v8 = vpop.f32.mrf.mxu1  ;;  %v872_v57 = vadd.f32 %v834_v16, %v752_v53  ;;  %v2794_v53 = vmov 0.0  }
  0xf0   : > { %v945_v22 = vpop.f32.mrf.mxu3  ;;  %v781_v61 = vadd.f32 %v780_v17, %v710_v8  ;;  %1152 = vst.msk [vmem:[#allocation2] sm:$0xff] %vm1151_vm3, %v2794_v53 }
  0xf1   : > { %1153 = vst.msk [vmem:[#allocation2 + $0x8] sm:$0xff] %vm1151_vm3, %v2794_v53 }
  0xf2   : > { %1155 = vst.msk [vmem:[#allocation2 + $0x10] sm:$0x3] %vm1154_vm4, %v2794_v53  ;;  %v1359_v53 = vld [vmem:[#allocation3 + $0x218] sm:$0xff] }
  0xf5   : > { %v919_v29 = vpop.f32.mrf.mxu2 }
  0xf6   : > { %v1007_v20 = vpop.f32.mrf.mxu0  ;;  %v959_v1 = vadd.f32 %v919_v29, %v868_v11  ;;  %v1083_v29 = vld [vmem:[%s3287_s3 + $0x8] sm:$0x3f] }
  0xf7   : > { %v854_v12 = vpop.f32.mrf.mxu1  ;;  %v1048_v30 = vadd.f32 %v1007_v20, %v957_v27  ;;  %v1082_v27 = vld [vmem:[%s3287_s3] sm:$0xff]  ;;  %v1207_v11 = vld [vmem:[#allocation3 + $0x110] sm:$0xff] }
  0xf8   : > { %v867_v28 = vadd.f32 %v854_v12, %v772_v24  ;;  %v948_v35 = vpop.f32.mrf.mxu3 }
  0xf9   : > { %v1062_v37 = vadd.f32 %v1058_v31, %v1048_v30  ;;  %v1119_v30 = vld [vmem:[%s3288_s4 + $0x8] sm:$0x3f] }
  0xfa   : > { %v958_v33 = vadd.f32 %v945_v22, %v867_v28  ;;  %v1118_v28 = vld [vmem:[%s3288_s4] sm:$0xff] }
  0xfb   : > { %v1070_v40 = vmax.f32 %v1062_v37, 0.0  ;;  %v1221_v37 = vld [vmem:[#allocation3 + $0x180] sm:$0xff] }
  0xfd   : > { %v922_v42 = vpop.f32.mrf.mxu2 }
  0xfe   : > { %v1010_v32 = vpop.f32.mrf.mxu0  ;;  %v961_v50 = vadd.f32 %v922_v42, %v870_v48  ;;  %v1195_v42 = vld [vmem:[#allocation3 + $0xc8] sm:$0xff] }
  0xff   : > { %v857_v15 = vpop.f32.mrf.mxu1  ;;  %v1050_v16 = vadd.f32 %v1010_v32, %v959_v1  ;;  %v1228_v32 = vld [vmem:[#allocation3 + $0x1b8] sm:$0xf]  ;;  %v1218_v48 = vld [vmem:[#allocation3 + $0x168] sm:$0xff] }
 0x100   : > { %v951_v49 = vpop.f32.mrf.mxu3  ;;  %v869_v63 = vadd.f32 %v857_v15, %v775_v54  ;;  %v1188_v54 = vld [vmem:[#allocation3 + $0x90] sm:$0xff] }
 0x101   : > { %v1064_v21 = vadd.f32 %v1058_v31, %v1050_v16  ;;  %v1204_v16 = vld [vmem:[#allocation3 + $0xf8] sm:$0xff] }
 0x102   : > { %v960_v13 = vadd.f32 %v948_v35, %v869_v63  ;;  %v1223_v35 = vld [vmem:[#allocation3 + $0x190] sm:$0xff]  ;;  %v1212_v63 = vld [vmem:[#allocation3 + $0x138] sm:$0xff] }
 0x103   : > { %v1072_v25 = vmax.f32 %v1064_v21, 0.0  ;;  %v1374_v21 = vld [vmem:[#allocation3 + $0x290] sm:$0xf] }
 0x105   : > { %v925_v58 = vpop.f32.mrf.mxu2 }
 0x106   : > { %v1013_v45 = vpop.f32.mrf.mxu0  ;;  %v963_v4 = vadd.f32 %v925_v58, %v872_v57  ;;  %v1214_v57 = vld [vmem:[#allocation3 + $0x148] sm:$0xff]  ;;  %v1186_v58 = vld [vmem:[#allocation3 + $0x80] sm:$0xff] }
 0x107   : > { %v860_v18 = vpop.f32.mrf.mxu1  ;;  %v1052_v52 = vadd.f32 %v1013_v45, %v961_v50  ;;  %v1192_v45 = vld [vmem:[#allocation3 + $0xb0] sm:$0xff]  ;;  %v1191_v50 = vld [vmem:[#allocation3 + $0xa8] sm:$0xff] }
 0x108   : > { %v871_v51 = vadd.f32 %v860_v18, %v778_v47  ;;  %v954_v12 = vpop.f32.mrf.mxu3  ;;  %v1217_v47 = vld [vmem:[#allocation3 + $0x160] sm:$0xff] }
 0x109   : > { %v1066_v2 = vadd.f32 %v1058_v31, %v1052_v52  ;;  %v1216_v52 = vld [vmem:[#allocation3 + $0x158] sm:$0xff] }
 0x10a   : > { %v962_v55 = vadd.f32 %v951_v49, %v871_v51  ;;  %v1190_v49 = vld [vmem:[#allocation3 + $0xa0] sm:$0xff]  ;;  %v1215_v51 = vld [vmem:[#allocation3 + $0x150] sm:$0xff] }
 0x10b   : > { %v1074_v18 = vmax.f32 %v1066_v2, 0.0  ;;  %v1184_v2 = vld [vmem:[#allocation3 + $0x70] sm:$0xff] }
 0x10e   : > { %v1016_v3 = vpop.f32.mrf.mxu0 }
 0x10f   : > { %v863_v23 = vpop.f32.mrf.mxu1  ;;  %v1054_v19 = vadd.f32 %v1016_v3, %v963_v4  ;;  %v1209_v3 = vld [vmem:[#allocation3 + $0x120] sm:$0xff]  ;;  %v1210_v4 = vld [vmem:[#allocation3 + $0x128] sm:$0xff] }
 0x110   : > { %v873_v10 = vadd.f32 %v863_v23, %v781_v61  ;;  %v1211_v61 = vld [vmem:[#allocation3 + $0x130] sm:$0xff] }
 0x111   : > { %v1068_v8 = vadd.f32 %v1058_v31, %v1054_v19  ;;  %v1227_v31 = vld [vmem:[#allocation3 + $0x1b0] sm:$0xf]  ;;  %v1205_v19 = vld [vmem:[#allocation3 + $0x100] sm:$0xff] }
 0x112   : > { %v964_v9 = vadd.f32 %v954_v12, %v873_v10  ;;  %v1182_v10 = vld [vmem:[#allocation3 + $0x60] sm:$0xff]  ;;  %v1208_v12 = vld [vmem:[#allocation3 + $0x118] sm:$0xff] }
 0x113   : > { %v1076_v22 = vmax.f32 %v1068_v8, 0.0  ;;  %v1179_v8 = vld [vmem:[#allocation3 + $0x48] sm:$0xff] }
 0x117   : > { %v1036_v36 = vpop.f32.mrf.mxu1 }
 0x118   : > { %v1049_v38 = vadd.f32 %v1036_v36, %v958_v33  ;;  %v1225_v33 = vld [vmem:[#allocation3 + $0x1a0] sm:$0xff]  ;;  %v1224_v36 = vld [vmem:[#allocation3 + $0x198] sm:$0xff] }
 0x11a   : > { %v1063_v39 = vadd.f32 %v1059_v34, %v1049_v38  ;;  %v1222_v38 = vld [vmem:[#allocation3 + $0x188] sm:$0xff] }
 0x11c   : > { %v1071_v41 = vmax.f32 %v1063_v39, 0.0  ;;  %v1196_v39 = vld [vmem:[#allocation3 + $0xd0] sm:$0xf] }
 0x11d   : > { %2297 = vmatpush.msk.msrb.mxu0 %vm1091_vm1, %v1196_v39  ;;  %v1467_v39 = vld [vmem:[#allocation3 + $0x370] sm:$0xf] }
 0x11e   : > { %v1078_v44 = vmax.f32 %v1070_v40, %v1071_v41  ;;  %v1197_v40 = vld [vmem:[#allocation3 + $0xd8] sm:$0xf]  ;;  %v1194_v41 = vld [vmem:[#allocation3 + $0xc0] sm:$0xff] }
 0x11f   : > { %v1039_v46 = vpop.f32.mrf.mxu1  ;;  %2300 = vmatpush.msk.msra.mxu1 %vm1091_vm1, %v1197_v40  ;;  %1302 = vmatpush.msrb.mxu0 %v1194_v41  ;;  %v1367_v40 = vld [vmem:[#allocation3 + $0x258] sm:$0xff] }
 0x120   : > { %v1051_v0 = vadd.f32 %v1039_v46, %v960_v13  ;;  %v1193_v46 = vld [vmem:[#allocation3 + $0xb8] sm:$0xff]  ;;  %v1180_v13 = vld [vmem:[#allocation3 + $0x50] sm:$0xff] }
 0x121   : > { %1325 = vmatpush.msra.mxu1 %v1195_v42  ;;  %1303 = vmatpush.msrb.mxu0 %v1192_v45  ;;  %v1468_v41 = vld [vmem:[#allocation3 + $0x378] sm:$0xf]  ;;  %v1364_v42 = vld [vmem:[#allocation3 + $0x240] sm:$0xff]  ;;  %v1466_v45 = vld [vmem:[#allocation3 + $0x368] sm:$0xff] }
 0x122   : > { %v1065_v17 = vadd.f32 %v1059_v34, %v1051_v0  ;;  %v1178_v0 = vld [vmem:[#allocation3 + $0x40] sm:$0xff] }
 0x123   : > { %1326 = vmatpush.msra.mxu1 %v1193_v46  ;;  %1304 = vmatpush.msrb.mxu0 %v1190_v49  ;;  %v1362_v46 = vld [vmem:[#allocation3 + $0x230] sm:$0xff]  ;;  %v1361_v49 = vld [vmem:[#allocation3 + $0x228] sm:$0xff] }
 0x124   : > { %v1073_v7 = vmax.f32 %v1065_v17, 0.0  ;;  %v1201_v17 = vld [vmem:[#allocation3 + $0xe0] sm:$0xff] }
 0x125   : > { %1327 = vmatpush.msra.mxu1 %v1191_v50  ;;  %1305 = vmatpush.msrb.mxu0 %v1188_v54  ;;  %v1463_v50 = vld [vmem:[#allocation3 + $0x350] sm:$0xff]  ;;  %v1461_v54 = vld [vmem:[#allocation3 + $0x340] sm:$0xff] }
 0x126   : > { %v1079_v26 = vmax.f32 %v1072_v25, %v1073_v7  ;;  %v1174_v7 = vld [vmem:[#allocation3 + $0x20] sm:$0xff]  ;;  %v1373_v25 = vld [vmem:[#allocation3 + $0x288] sm:$0xff] }
 0x127   : > { %v1042_v59 = vpop.f32.mrf.mxu1  ;;  %1306 = vmatpush.msrb.mxu0 %v1186_v58  ;;  %v1459_v58 = vld [vmem:[#allocation3 + $0x330] sm:$0xff] }
 0x128   : > { %v1053_v60 = vadd.f32 %v1042_v59, %v962_v55  ;;  %v1189_v55 = vld [vmem:[#allocation3 + $0x98] sm:$0xff]  ;;  %v1187_v59 = vld [vmem:[#allocation3 + $0x88] sm:$0xff] }
 0x129   : > { %1328 = vmatpush.msra.mxu1 %v1189_v55  ;;  %1307 = vmatpush.msrb.mxu0 %v1184_v2  ;;  %v1462_v55 = vld [vmem:[#allocation3 + $0x348] sm:$0xff]  ;;  %v1457_v2 = vld [vmem:[#allocation3 + $0x320] sm:$0xff] }
 0x12a   : > { %v1067_v5 = vadd.f32 %v1059_v34, %v1053_v60  ;;  %v1185_v60 = vld [vmem:[#allocation3 + $0x78] sm:$0xff] }
 0x12b   : > { %1329 = vmatpush.msra.mxu1 %v1187_v59  ;;  %1308 = vmatpush.msrb.mxu0 %v1182_v10  ;;  %v1460_v59 = vld [vmem:[#allocation3 + $0x338] sm:$0xff]  ;;  %v1455_v10 = vld [vmem:[#allocation3 + $0x310] sm:$0xff] }
 0x12c   : > { %v1075_v62 = vmax.f32 %v1067_v5, 0.0  ;;  %v1183_v5 = vld [vmem:[#allocation3 + $0x68] sm:$0xff] }
 0x12d   : > { %1330 = vmatpush.msra.mxu1 %v1185_v60  ;;  %1309 = vmatpush.msrb.mxu0 %v1180_v13  ;;  %v1458_v60 = vld [vmem:[#allocation3 + $0x328] sm:$0xff]  ;;  %v1453_v13 = vld [vmem:[#allocation3 + $0x300] sm:$0xff] }
 0x12e   : > { %v1080_v6 = vmax.f32 %v1074_v18, %v1075_v62  ;;  %v1181_v18 = vld [vmem:[#allocation3 + $0x58] sm:$0xff]  ;;  %v1206_v62 = vld [vmem:[#allocation3 + $0x108] sm:$0xff] }
 0x12f   : > { %v1045_v14 = vpop.f32.mrf.mxu1  ;;  %1331 = vmatpush.msra.mxu1 %v1183_v5  ;;  %1310 = vmatpush.msrb.mxu0 %v1178_v0  ;;  %v1456_v5 = vld [vmem:[#allocation3 + $0x318] sm:$0xff]  ;;  %v1449_v0 = vld [vmem:[#allocation3 + $0x2e0] sm:$0xff] }
 0x130   : > { %v1055_v15 = vadd.f32 %v1045_v14, %v964_v9  ;;  %v1203_v14 = vld [vmem:[#allocation3 + $0xf0] sm:$0xff] }
 0x131   : > { %1332 = vmatpush.msra.mxu1 %v1181_v18  ;;  %v1454_v18 = vld [vmem:[#allocation3 + $0x308] sm:$0xff] }
 0x132   : > { %v1069_v20 = vadd.f32 %v1059_v34, %v1055_v15  ;;  %v1226_v34 = vld [vmem:[#allocation3 + $0x1a8] sm:$0xff]  ;;  %v1176_v15 = vld [vmem:[#allocation3 + $0x30] sm:$0xff] }
 0x133   : > { %1333 = vmatpush.msra.mxu1 %v1179_v8  ;;  %1311 = vmatpush.msrb.mxu0 %v1176_v15  ;;  %v1445_v8 = vld [vmem:[#allocation3 + $0x2c0] sm:$0xff]  ;;  %v1446_v15 = vld [vmem:[#allocation3 + $0x2c8] sm:$0xff] }
 0x134   : > { %v1077_v23 = vmax.f32 %v1069_v20, 0.0  ;;  %v1202_v20 = vld [vmem:[#allocation3 + $0xe8] sm:$0xff] }
 0x135   : > { %1312 = vmatpush.msrb.mxu0 %v1174_v7  ;;  %v1560_v7 = vld [vmem:[#allocation3 + $0x450] sm:$0xf] }
 0x136   : > { %v1081_v24 = vmax.f32 %v1076_v22, %v1077_v23  ;;  %v1375_v22 = vld [vmem:[#allocation3 + $0x298] sm:$0xf] }
 0x137   : > { %v1177_v23 = vld [vmem:[#allocation3 + $0x38] sm:$0xff] }
 0x138   : > { %2285 = vmatpush.msk.msra.mxu2 %vm1091_vm1, %v1081_v24  ;;  %2288 = vmatpush.msk.msra.mxu3 %vm1091_vm1, %v1081_v24  ;;  %v1372_v24 = vld [vmem:[#allocation3 + $0x280] sm:$0xff] }
 0x139   : > { %1334 = vmatpush.msra.mxu1 %v1177_v23 }
 0x13a   : > { %1108 = vmatpush.msra.mxu2 %v1080_v6  ;;  %1139 = vmatpush.msra.mxu3 %v1080_v6 }
 0x13c   : > { %1109 = vmatpush.msra.mxu2 %v1079_v26  ;;  %1140 = vmatpush.msra.mxu3 %v1079_v26  ;;  %v1175_v26 = vld [vmem:[#allocation3 + $0x28] sm:$0xff] }
 0x13d   : > { %1335 = vmatpush.msra.mxu1 %v1175_v26 }
 0x13e   : > { %1110 = vmatpush.msra.mxu2 %v1078_v44  ;;  %1141 = vmatpush.msra.mxu3 %v1078_v44  ;;  %v1220_v44 = vld [vmem:[#allocation3 + $0x178] sm:$0xff] }
 0x13f   : > { %2286 = vmatmul.msk.f32.vlgmr.msra.gmra.mxu2 %vm1084_vm2, %v1082_v27  ;;  %2289 = vmatmul.msk.f32.vlgmr.msra.gmra.mxu3 %vm1084_vm2, %v1118_v28  ;;  %v1172_v27 = vld [vmem:[#allocation3 + $0x10] sm:$0xff] }
 0x140   : > { %2291 = vmatpush.msk.msrb.mxu2 %vm1091_vm1, %v1227_v31  ;;  %2294 = vmatpush.msk.msrb.mxu3 %vm1091_vm1, %v1228_v32  ;;  %v1371_v32 = vld [vmem:[#allocation3 + $0x278] sm:$0xff] }
 0x141   : > { %1313 = vmatpush.msrb.mxu0 %v1172_v27  ;;  %v1561_v27 = vld [vmem:[#allocation3 + $0x458] sm:$0xf] }
 0x142   : > { %1244 = vmatpush.msrb.mxu2 %v1225_v33  ;;  %1267 = vmatpush.msrb.mxu3 %v1226_v34  ;;  %v1173_v33 = vld [vmem:[#allocation3 + $0x18] sm:$0xff]  ;;  %v1368_v34 = vld [vmem:[#allocation3 + $0x260] sm:$0xff] }
 0x143   : > { %1336 = vmatpush.msra.mxu1 %v1173_v33 }
 0x144   : > { %1245 = vmatpush.msrb.mxu2 %v1223_v35  ;;  %1268 = vmatpush.msrb.mxu3 %v1224_v36  ;;  %v1170_v35 = vld [vmem:[#allocation3] sm:$0xff]  ;;  %v1369_v36 = vld [vmem:[#allocation3 + $0x268] sm:$0xff] }
 0x145   : > { %1314 = vmatpush.msrb.mxu0 %v1170_v35  ;;  %v1555_v35 = vld [vmem:[#allocation3 + $0x428] sm:$0xff] }
 0x146   : > { %1246 = vmatpush.msrb.mxu2 %v1221_v37  ;;  %1269 = vmatpush.msrb.mxu3 %v1222_v38  ;;  %v1171_v37 = vld [vmem:[#allocation3 + $0x8] sm:$0xff]  ;;  %v1366_v38 = vld [vmem:[#allocation3 + $0x250] sm:$0xff] }
 0x147   : > { %2287 = vmatmul.msk.f32.gmra.mxu2 %vm1084_vm2, %v1083_v29  ;;  %2290 = vmatmul.msk.f32.gmra.mxu3 %vm1084_vm2, %v1119_v30  ;;  %v1370_v30 = vld [vmem:[#allocation3 + $0x270] sm:$0xff] }
 0x148   : > { %1247 = vmatpush.msrb.mxu2 %v1219_v43  ;;  %1270 = vmatpush.msrb.mxu3 %v1220_v44  ;;  %v1465_v43 = vld [vmem:[#allocation3 + $0x360] sm:$0xff]  ;;  %v1365_v44 = vld [vmem:[#allocation3 + $0x248] sm:$0xff] }
 0x149   : > { %1337 = vmatpush.msra.mxu1 %v1171_v37  ;;  %2309 = vmatpush.msk.msra.mxu0 %vm1091_vm1, %v1467_v39  ;;  %v1553_v37 = vld [vmem:[#allocation3 + $0x418] sm:$0xff]  ;;  %v1551_v39 = vld [vmem:[#allocation3 + $0x408] sm:$0xff] }
 0x14a   : > { %1248 = vmatpush.msrb.mxu2 %v1217_v47  ;;  %1271 = vmatpush.msrb.mxu3 %v1218_v48  ;;  %v1363_v47 = vld [vmem:[#allocation3 + $0x238] sm:$0xff]  ;;  %v1360_v48 = vld [vmem:[#allocation3 + $0x220] sm:$0xff] }
 0x14b   : > { %2312 = vmatpush.msk.msrb.mxu1 %vm1091_vm1, %v1468_v41  ;;  %1484 = vmatpush.msra.mxu0 %v1465_v43  ;;  %v1548_v41 = vld [vmem:[#allocation3 + $0x3f0] sm:$0xff] }
 0x14c   : > { %1249 = vmatpush.msrb.mxu2 %v1215_v51  ;;  %1272 = vmatpush.msrb.mxu3 %v1216_v52  ;;  %v1464_v51 = vld [vmem:[#allocation3 + $0x358] sm:$0xff]  ;;  %v1358_v52 = vld [vmem:[#allocation3 + $0x210] sm:$0xff] }
 0x14d   : > { %1507 = vmatpush.msrb.mxu1 %v1466_v45  ;;  %1485 = vmatpush.msra.mxu0 %v1463_v50  ;;  %v1547_v45 = vld [vmem:[#allocation3 + $0x3e8] sm:$0xff] }
 0x14e   : > { %1250 = vmatpush.msrb.mxu2 %v1213_v56  ;;  %1273 = vmatpush.msrb.mxu3 %v1214_v57  ;;  %v1356_v56 = vld [vmem:[#allocation3 + $0x200] sm:$0xff]  ;;  %v1357_v57 = vld [vmem:[#allocation3 + $0x208] sm:$0xff] }
 0x14f   : > { %1508 = vmatpush.msrb.mxu1 %v1464_v51  ;;  %1486 = vmatpush.msra.mxu0 %v1461_v54  ;;  %v1540_v51 = vld [vmem:[#allocation3 + $0x3b0] sm:$0xff]  ;;  %v1538_v54 = vld [vmem:[#allocation3 + $0x3a0] sm:$0xff] }
 0x150   : > { %1251 = vmatpush.msrb.mxu2 %v1211_v61  ;;  %1274 = vmatpush.msrb.mxu3 %v1212_v63  ;;  %v1354_v61 = vld [vmem:[#allocation3 + $0x1f0] sm:$0xff]  ;;  %v1355_v63 = vld [vmem:[#allocation3 + $0x1f8] sm:$0xff] }
 0x151   : > { %1509 = vmatpush.msrb.mxu1 %v1462_v55  ;;  %1487 = vmatpush.msra.mxu0 %v1459_v58  ;;  %v1539_v55 = vld [vmem:[#allocation3 + $0x3a8] sm:$0xff]  ;;  %v1534_v58 = vld [vmem:[#allocation3 + $0x380] sm:$0xff] }
 0x152   : > { %1252 = vmatpush.msrb.mxu2 %v1209_v3  ;;  %1275 = vmatpush.msrb.mxu3 %v1210_v4  ;;  %v1352_v3 = vld [vmem:[#allocation3 + $0x1e0] sm:$0xff]  ;;  %v1353_v4 = vld [vmem:[#allocation3 + $0x1e8] sm:$0xff] }
 0x153   : > { %1510 = vmatpush.msrb.mxu1 %v1460_v59  ;;  %1488 = vmatpush.msra.mxu0 %v1457_v2  ;;  %v1535_v59 = vld [vmem:[#allocation3 + $0x388] sm:$0xff] }
 0x154   : > { %1253 = vmatpush.msrb.mxu2 %v1207_v11  ;;  %1276 = vmatpush.msrb.mxu3 %v1208_v12  ;;  %v1350_v11 = vld [vmem:[#allocation3 + $0x1d0] sm:$0xff]  ;;  %v1351_v12 = vld [vmem:[#allocation3 + $0x1d8] sm:$0xff] }
 0x155   : > { %1511 = vmatpush.msrb.mxu1 %v1458_v60  ;;  %1489 = vmatpush.msra.mxu0 %v1455_v10 }
 0x156   : > { %1254 = vmatpush.msrb.mxu2 %v1205_v19  ;;  %1277 = vmatpush.msrb.mxu3 %v1206_v62  ;;  %v1348_v19 = vld [vmem:[#allocation3 + $0x1c0] sm:$0xff]  ;;  %v1349_v62 = vld [vmem:[#allocation3 + $0x1c8] sm:$0xff] }
 0x157   : > { %1512 = vmatpush.msrb.mxu1 %v1456_v5  ;;  %1490 = vmatpush.msra.mxu0 %v1453_v13 }
 0x158   : > { %1255 = vmatpush.msrb.mxu2 %v1203_v14  ;;  %1278 = vmatpush.msrb.mxu3 %v1204_v16  ;;  %v1447_v14 = vld [vmem:[#allocation3 + $0x2d0] sm:$0xff]  ;;  %v1448_v16 = vld [vmem:[#allocation3 + $0x2d8] sm:$0xff] }
 0x159   : > { %1513 = vmatpush.msrb.mxu1 %v1454_v18 }
 0x15a   : > { %1256 = vmatpush.msrb.mxu2 %v1201_v17  ;;  %1279 = vmatpush.msrb.mxu3 %v1202_v20  ;;  %v1443_v17 = vld [vmem:[#allocation3 + $0x2b0] sm:$0xff]  ;;  %v1444_v20 = vld [vmem:[#allocation3 + $0x2b8] sm:$0xff] }
 0x15c   : > { %2303 = vmatpush.msk.msra.mxu2 %vm1091_vm1, %v1374_v21  ;;  %2306 = vmatpush.msk.msra.mxu3 %vm1091_vm1, %v1375_v22  ;;  %v1441_v21 = vld [vmem:[#allocation3 + $0x2a0] sm:$0xff]  ;;  %v1442_v22 = vld [vmem:[#allocation3 + $0x2a8] sm:$0xff] }
 0x15e   : > { %1391 = vmatpush.msra.mxu2 %v1372_v24  ;;  %1414 = vmatpush.msra.mxu3 %v1373_v25 }
 0x160   : > { %1392 = vmatpush.msra.mxu2 %v1370_v30  ;;  %1415 = vmatpush.msra.mxu3 %v1371_v32  ;;  %v1556_v30 = vld [vmem:[#allocation3 + $0x430] sm:$0xff]  ;;  %v1554_v32 = vld [vmem:[#allocation3 + $0x420] sm:$0xff] }
 0x162   : > { %1393 = vmatpush.msra.mxu2 %v1368_v34  ;;  %1416 = vmatpush.msra.mxu3 %v1369_v36  ;;  %v1552_v36 = vld [vmem:[#allocation3 + $0x410] sm:$0xff] }
 0x164   : > { %1394 = vmatpush.msra.mxu2 %v1366_v38  ;;  %1417 = vmatpush.msra.mxu3 %v1367_v40  ;;  %v1550_v38 = vld [vmem:[#allocation3 + $0x400] sm:$0xff] }
 0x166   : > { %1395 = vmatpush.msra.mxu2 %v1364_v42  ;;  %1418 = vmatpush.msra.mxu3 %v1365_v44  ;;  %v1549_v42 = vld [vmem:[#allocation3 + $0x3f8] sm:$0xff]  ;;  %v1546_v44 = vld [vmem:[#allocation3 + $0x3e0] sm:$0xff] }
 0x168   : > { %1396 = vmatpush.msra.mxu2 %v1362_v46  ;;  %1419 = vmatpush.msra.mxu3 %v1363_v47  ;;  %v1544_v46 = vld [vmem:[#allocation3 + $0x3d0] sm:$0xff]  ;;  %v1545_v47 = vld [vmem:[#allocation3 + $0x3d8] sm:$0xff] }
 0x16a   : > { %1397 = vmatpush.msra.mxu2 %v1360_v48  ;;  %1420 = vmatpush.msra.mxu3 %v1361_v49  ;;  %v1542_v48 = vld [vmem:[#allocation3 + $0x3c0] sm:$0xff]  ;;  %v1543_v49 = vld [vmem:[#allocation3 + $0x3c8] sm:$0xff] }
 0x16c   : > { %1398 = vmatpush.msra.mxu2 %v1358_v52  ;;  %1421 = vmatpush.msra.mxu3 %v1359_v53  ;;  %v1541_v52 = vld [vmem:[#allocation3 + $0x3b8] sm:$0xff] }
 0x16e   : > { %1399 = vmatpush.msra.mxu2 %v1356_v56  ;;  %1422 = vmatpush.msra.mxu3 %v1357_v57  ;;  %v1536_v56 = vld [vmem:[#allocation3 + $0x390] sm:$0xff]  ;;  %v1537_v57 = vld [vmem:[#allocation3 + $0x398] sm:$0xff] }
 0x170   : > { %1400 = vmatpush.msra.mxu2 %v1354_v61  ;;  %1423 = vmatpush.msra.mxu3 %v1355_v63 }
 0x172   : > { %1401 = vmatpush.msra.mxu2 %v1352_v3  ;;  %1424 = vmatpush.msra.mxu3 %v1353_v4 }
 0x174   : > { %1402 = vmatpush.msra.mxu2 %v1350_v11  ;;  %1425 = vmatpush.msra.mxu3 %v1351_v12 }
 0x176   : > { %1403 = vmatpush.msra.mxu2 %v1348_v19  ;;  %1426 = vmatpush.msra.mxu3 %v1349_v62  ;;  %v1787_v19 = vld [vmem:[#allocation8 + $0x178] sm:$0xff]  ;;  %v1786_v62 = vld [vmem:[#allocation8 + $0x170] sm:$0xff] }
 0x1c2   : > { %v1112_v1 = vpop.f32.mrf.mxu2  ;;  %v1143_v9 = vpop.f32.mrf.mxu3 }
 0x1c3   : > { %v1149_v6 = vmax.f32 %v1112_v1, %v1143_v9  ;;  %v1451_v1 = vld [vmem:[#allocation3 + $0x2f0] sm:$0xff]  ;;  %v1452_v9 = vld [vmem:[#allocation3 + $0x2f8] sm:$0xff] }
 0x1c4   : > { %1491 = vmatpush.msra.mxu0 %v1451_v1  ;;  %1514 = vmatpush.msrb.mxu1 %v1452_v9 }
 0x1c5   : > { %1158 = vrot.lane.b32.xlu0 %v1149_v6, %s2795_s20  ;;  %v1450_v6 = vld [vmem:[#allocation3 + $0x2e8] sm:$0xff] }
 0x1c6   : > { %1492 = vmatpush.msra.mxu0 %v1449_v0  ;;  %1515 = vmatpush.msrb.mxu1 %v1450_v6  ;;  %v1785_v0 = vld [vmem:[#allocation8 + $0x168] sm:$0xff]  ;;  %v1784_v6 = vld [vmem:[#allocation8 + $0x160] sm:$0xff] }
 0x1c8   : > { %1493 = vmatpush.msra.mxu0 %v1447_v14  ;;  %1516 = vmatpush.msrb.mxu1 %v1448_v16  ;;  %v1783_v14 = vld [vmem:[#allocation8 + $0x158] sm:$0xff] }
 0x1ca   : > { %v1115_v28 = vpop.f32.mrf.mxu2  ;;  %v1146_v29 = vpop.f32.mrf.mxu3  ;;  %1494 = vmatpush.msra.mxu0 %v1445_v8  ;;  %1517 = vmatpush.msrb.mxu1 %v1446_v15 }
 0x1cb   : > { %v1150_v31 = vmax.f32 %v1115_v28, %v1146_v29  ;;  %v1558_v28 = vld [vmem:[#allocation3 + $0x440] sm:$0xff]  ;;  %v1559_v29 = vld [vmem:[#allocation3 + $0x448] sm:$0xff] }
 0x1cc   : > { %1495 = vmatpush.msra.mxu0 %v1443_v17  ;;  %1518 = vmatpush.msrb.mxu1 %v1444_v20  ;;  %v1782_v20 = vld [vmem:[#allocation8 + $0x150] sm:$0xff] }
 0x1cd   : > { %1160 = vrot.lane.b32.xlu0 %v1150_v31, %s2795_s20  ;;  %v1557_v31 = vld [vmem:[#allocation3 + $0x438] sm:$0xff] }
 0x1ce   : > { %1496 = vmatpush.msra.mxu0 %v1441_v21  ;;  %1519 = vmatpush.msrb.mxu1 %v1442_v22 }
 0x237   : > { %v1159_v23 = vpop.permute.xlu0 %1158 }
 0x238   : > { %1165 = vst.msk [vmem:[#allocation2 + $0x2] sm:$0xff] %vm1164_vm5, %v1159_v23  ;;  %v1781_v23 = vld [vmem:[#allocation8 + $0x148] sm:$0xff] }
 0x23f   : > { %v1161_v24 = vpop.permute.xlu0 %1160  ;;  %v1198_v25 = vld [vmem:[#allocation2 + $0x1] sm:$0xff] }
 0x240   : > { %v1168_v26 = vld [vmem:[#allocation2] sm:$0xff]  ;;  %1167 = vst.msk [vmem:[#allocation2 + $0xa] sm:$0x3f] %vm1166_vm6, %v1161_v24  ;;  %2292 = vmatmul.msk.f32.vlgmr.msrb.gmra.mxu2 %vm1151_vm3, %v1198_v25  ;;  %2295 = vmatmul.msk.f32.vlgmr.msrb.gmra.mxu3 %vm1151_vm3, %v1198_v25 }
 0x241   : > { %2298 = vmatmul.msk.f32.vlgmr.msrb.gmra.mxu0 %vm1151_vm3, %v1168_v26  ;;  %2301 = vmatmul.msk.f32.vlgmr.msra.gmra.mxu1 %vm1151_vm3, %v1168_v26  ;;  %v1345_v40 = vld [vmem:[#allocation2 + $0x2] sm:$0xff] }
 0x242   : > { %2315 = vmatpush.msk.msrb.mxu2 %vm1091_vm1, %v1560_v7  ;;  %2318 = vmatpush.msk.msrb.mxu3 %vm1091_vm1, %v1561_v27  ;;  %v1780_v27 = vld [vmem:[#allocation8 + $0x140] sm:$0xff] }
 0x244   : > { %1577 = vmatpush.msrb.mxu2 %v1558_v28  ;;  %1600 = vmatpush.msrb.mxu3 %v1559_v29  ;;  %v1624_v28 = vld [vmem:[#allocation6] sm:$0x3] }
 0x246   : > { %1578 = vmatpush.msrb.mxu2 %v1556_v30  ;;  %1601 = vmatpush.msrb.mxu3 %v1557_v31 }
 0x247   : > { %v1199_v33 = vld [vmem:[#allocation2 + $0x9] sm:$0x3f] }
 0x248   : > { %v1169_v34 = vld [vmem:[#allocation2 + $0x8] sm:$0x3f]  ;;  %2293 = vmatmul.msk.f32.gmra.mxu2 %vm1151_vm3, %v1199_v33  ;;  %2296 = vmatmul.msk.f32.gmra.mxu3 %vm1151_vm3, %v1199_v33  ;;  %v1779_v33 = vld [vmem:[#allocation8 + $0x138] sm:$0xff] }
 0x249   : > { %2299 = vmatmul.msk.f32.gmra.mxu0 %vm1151_vm3, %v1169_v34  ;;  %2302 = vmatmul.msk.f32.gmra.mxu1 %vm1151_vm3, %v1169_v34  ;;  %v1438_v43 = vld [vmem:[#allocation2 + $0x3] sm:$0xff]  ;;  %v1439_v53 = vld [vmem:[#allocation2 + $0xb] sm:$0x3f] }
 0x24a   : > { %1579 = vmatpush.msrb.mxu2 %v1554_v32  ;;  %1602 = vmatpush.msrb.mxu3 %v1555_v35  ;;  %v1346_v50 = vld [vmem:[#allocation2 + $0xa] sm:$0x3f]  ;;  %v1626_v35 = vperm.slane %v1624_v28, 0 }
 0x24b   : > { %v1531_v61 = vld [vmem:[#allocation2 + $0x4] sm:$0xff]  ;;  %v1532_v63 = vld [vmem:[#allocation2 + $0xc] sm:$0x3f] }
 0x24c   : > { %1580 = vmatpush.msrb.mxu2 %v1552_v36  ;;  %1603 = vmatpush.msrb.mxu3 %v1553_v37  ;;  %v1627_v37 = vperm.slane %v1624_v28, 1  ;;  %v1704_v28 = vld [vmem:[#allocation8 + $0x48] sm:$0xff] }
 0x24e   : > { %1581 = vmatpush.msrb.mxu2 %v1550_v38  ;;  %1604 = vmatpush.msrb.mxu3 %v1551_v39  ;;  %v1778_v38 = vld [vmem:[#allocation8 + $0x130] sm:$0xff] }
 0x250   : > { %2304 = vmatmul.msk.f32.vlgmr.msra.gmra.mxu2 %vm1151_vm3, %v1345_v40  ;;  %2307 = vmatmul.msk.f32.vlgmr.msra.gmra.mxu3 %vm1151_vm3, %v1345_v40 }
 0x251   : > { %2310 = vmatmul.msk.f32.vlgmr.msra.gmra.mxu0 %vm1151_vm3, %v1438_v43  ;;  %2313 = vmatmul.msk.f32.vlgmr.msrb.gmra.mxu1 %vm1151_vm3, %v1438_v43  ;;  %v1777_v43 = vld [vmem:[#allocation8 + $0x128] sm:$0xff] }
 0x252   : > { %1582 = vmatpush.msrb.mxu2 %v1548_v41  ;;  %1605 = vmatpush.msrb.mxu3 %v1549_v42 }
 0x254   : > { %1583 = vmatpush.msrb.mxu2 %v1546_v44  ;;  %1606 = vmatpush.msrb.mxu3 %v1547_v45 }
 0x256   : > { %1584 = vmatpush.msrb.mxu2 %v1544_v46  ;;  %1607 = vmatpush.msrb.mxu3 %v1545_v47 }
 0x258   : > { %1585 = vmatpush.msrb.mxu2 %v1542_v48  ;;  %1608 = vmatpush.msrb.mxu3 %v1543_v49 }
 0x259   : > { %2305 = vmatmul.msk.f32.gmra.mxu2 %vm1151_vm3, %v1346_v50  ;;  %2308 = vmatmul.msk.f32.gmra.mxu3 %vm1151_vm3, %v1346_v50  ;;  %v1776_v50 = vld [vmem:[#allocation8 + $0x120] sm:$0xff] }
 0x25a   : > { %2311 = vmatmul.msk.f32.gmra.mxu0 %vm1151_vm3, %v1439_v53  ;;  %2314 = vmatmul.msk.f32.gmra.mxu1 %vm1151_vm3, %v1439_v53  ;;  %v1775_v53 = vld [vmem:[#allocation8 + $0x118] sm:$0xff] }
 0x25b   : > { %1586 = vmatpush.msrb.mxu2 %v1540_v51  ;;  %1609 = vmatpush.msrb.mxu3 %v1541_v52 }
 0x25d   : > { %1587 = vmatpush.msrb.mxu2 %v1538_v54  ;;  %1610 = vmatpush.msrb.mxu3 %v1539_v55  ;;  %v1826_v54 = vld [vmem:[#allocation8 + $0x1f8] sm:$0xff] }
 0x25f   : > { %1588 = vmatpush.msrb.mxu2 %v1536_v56  ;;  %1611 = vmatpush.msrb.mxu3 %v1537_v57 }
 0x261   : > { %1589 = vmatpush.msrb.mxu2 %v1534_v58  ;;  %1612 = vmatpush.msrb.mxu3 %v1535_v59  ;;  %v1774_v59 = vld [vmem:[#allocation8 + $0x110] sm:$0xff] }
 0x262   : > { %2316 = vmatmul.msk.f32.vlgmr.msrb.gmra.mxu2 %vm1151_vm3, %v1531_v61  ;;  %2319 = vmatmul.msk.f32.vlgmr.msrb.gmra.mxu3 %vm1151_vm3, %v1531_v61  ;;  %v1825_v61 = vld [vmem:[#allocation8 + $0x1f0] sm:$0xff] }
 0x263   : > { %1790 = vmatpush.msra.mxu2 %v1787_v19  ;;  %1829 = vmatpush.msra.mxu3 %v1826_v54  ;;  %v1709_v19 = vld [vmem:[#allocation8 + $0x70] sm:$0xff]  ;;  %v1865_v54 = vld [vmem:[#allocation8 + $0x278] sm:$0xff] }
 0x265   : > { %1791 = vmatpush.msra.mxu2 %v1786_v62  ;;  %1830 = vmatpush.msra.mxu3 %v1825_v61  ;;  %v1746_v62 = vld [vmem:[#allocation8 + $0xf0] sm:$0xff]  ;;  %v1862_v61 = vld [vmem:[#allocation8 + $0x260] sm:$0xff] }
 0x267   : > { %1792 = vmatpush.msra.mxu2 %v1785_v0  ;;  %v1708_v0 = vld [vmem:[#allocation8 + $0x68] sm:$0xff] }
 0x269   : > { %1793 = vmatpush.msra.mxu2 %v1784_v6  ;;  %v1745_v6 = vld [vmem:[#allocation8 + $0xe8] sm:$0xff] }
 0x26a   : > { %2317 = vmatmul.msk.f32.gmra.mxu2 %vm1151_vm3, %v1532_v63  ;;  %2320 = vmatmul.msk.f32.gmra.mxu3 %vm1151_vm3, %v1532_v63 }
 0x26b   : > { %1794 = vmatpush.msra.mxu2 %v1783_v14  ;;  %v1942_v14 = vld [vmem:[#allocation8 + $0x370] sm:$0xff] }
 0x26d   : > { %1795 = vmatpush.msra.mxu2 %v1782_v20  ;;  %v1819_v20 = vld [vmem:[#allocation8 + $0x1c0] sm:$0xff] }
 0x26f   : > { %1796 = vmatpush.msra.mxu2 %v1781_v23  ;;  %v1940_v23 = vld [vmem:[#allocation8 + $0x360] sm:$0xff] }
 0x271   : > { %1797 = vmatpush.msra.mxu2 %v1780_v27  ;;  %v1817_v27 = vld [vmem:[#allocation8 + $0x1b0] sm:$0xff] }
 0x273   : > { %1798 = vmatpush.msra.mxu2 %v1779_v33  ;;  %v1740_v33 = vld [vmem:[#allocation8 + $0xc0] sm:$0xff] }
 0x275   : > { %1799 = vmatpush.msra.mxu2 %v1778_v38  ;;  %v1936_v38 = vld [vmem:[#allocation8 + $0x340] sm:$0xff] }
 0x277   : > { %1800 = vmatpush.msra.mxu2 %v1777_v43  ;;  %v1737_v43 = vld [vmem:[#allocation8 + $0xa8] sm:$0xff] }
 0x279   : > { %1801 = vmatpush.msra.mxu2 %v1776_v50  ;;  %v1696_v50 = vld [vmem:[#allocation8 + $0x8] sm:$0xff] }
 0x27b   : > { %1802 = vmatpush.msra.mxu2 %v1775_v53  ;;  %v1732_v53 = vld [vmem:[#allocation8 + $0x80] sm:$0xff] }
 0x27d   : > { %1803 = vmatpush.msra.mxu2 %v1774_v59  ;;  %v1902_v59 = vld [vmem:[#allocation8 + $0x2e8] sm:$0xff] }
 0x2be   : > { %v1316_v10 = vpop.f32.mrf.mxu0  ;;  %v1339_v5 = vpop.f32.mrf.mxu1 }
 0x2c3   : > { %v1258_v2 = vpop.f32.mrf.mxu2  ;;  %v1281_v60 = vpop.f32.mrf.mxu3 }
 0x2c4   : > { %v1317_v15 = vadd.f32 %v1316_v10, %v1258_v2  ;;  %v1340_v17 = vadd.f32 %v1339_v5, %v1281_v60  ;;  %v1773_v2 = vld [vmem:[#allocation8 + $0x108] sm:$0xff]  ;;  %v1823_v5 = vld [vmem:[#allocation8 + $0x1e0] sm:$0xff] }
 0x2c5   : > { %v1824_v60 = vld [vmem:[#allocation8 + $0x1e8] sm:$0xff]  ;;  %1804 = vmatpush.msra.mxu2 %v1773_v2  ;;  %v1861_v2 = vld [vmem:[#allocation8 + $0x258] sm:$0xff] }
 0x2c6   : > { %v1319_v13 = vpop.f32.mrf.mxu0  ;;  %v1342_v18 = vpop.f32.mrf.mxu1  ;;  %1831 = vmatpush.msra.mxu3 %v1824_v60  ;;  %v1669_v10 = vld [vmem:[%s3292_s8] sm:$0x7f]  ;;  %v1900_v60 = vld [vmem:[#allocation8 + $0x2d8] sm:$0xff] }
 0x2c8   : > { %1832 = vmatpush.msra.mxu3 %v1823_v5  ;;  %v1898_v5 = vld [vmem:[#allocation8 + $0x2c8] sm:$0xff] }
 0x2cb   : > { %v1261_v3 = vpop.f32.mrf.mxu2  ;;  %v1284_v4 = vpop.f32.mrf.mxu3 }
 0x2cc   : > { %v1320_v25 = vadd.f32 %v1319_v13, %v1261_v3  ;;  %v1343_v26 = vadd.f32 %v1342_v18, %v1284_v4  ;;  %v1640_v4 = vld [vmem:[%s3291_s7] sm:$0x7f]  ;;  %v1822_v18 = vld [vmem:[#allocation8 + $0x1d8] sm:$0xff] }
 0x2cd   : > { %v1772_v13 = vld [vmem:[#allocation8 + $0x100] sm:$0xff]  ;;  %1833 = vmatpush.msra.mxu3 %v1822_v18  ;;  %v1814_v18 = vld [vmem:[#allocation8 + $0x198] sm:$0xff] }
 0x2ce   : > { %v1498_v16 = vpop.f32.mrf.mxu0  ;;  %v1521_v8 = vpop.f32.mrf.mxu1  ;;  %1805 = vmatpush.msra.mxu2 %v1772_v13  ;;  %v1897_v13 = vld [vmem:[#allocation8 + $0x2c0] sm:$0xff] }
 0x2d3   : > { %v1405_v11 = vpop.f32.mrf.mxu2  ;;  %v1428_v12 = vpop.f32.mrf.mxu3 }
 0x2d4   : > { %v1434_v21 = vadd.f32 %v1405_v11, %v1317_v15  ;;  %v1435_v22 = vadd.f32 %v1428_v12, %v1340_v17  ;;  %v1710_v11 = vld [vmem:[#allocation8 + $0x78] sm:$0xff]  ;;  %v1744_v15 = vld [vmem:[#allocation8 + $0xe0] sm:$0xff]  ;;  %v1941_v17 = vld [vmem:[#allocation8 + $0x368] sm:$0xff] }
 0x2d5   : > { %v1747_v12 = vld [vmem:[#allocation8 + $0xf8] sm:$0xff] }
 0x2d6   : > { %v1527_v31 = vadd.f32 %v1498_v16, %v1434_v21  ;;  %v1528_v32 = vadd.f32 %v1521_v8, %v1435_v22  ;;  %v1820_v16 = vld [vmem:[#allocation8 + $0x1c8] sm:$0xff]  ;;  %v1707_v8 = vld [vmem:[#allocation8 + $0x60] sm:$0xff]  ;;  %v1706_v21 = vld [vmem:[#allocation8 + $0x58] sm:$0xff] }
 0x2d7   : > { %v1501_v39 = vpop.f32.mrf.mxu0  ;;  %v1524_v40 = vpop.f32.mrf.mxu1  ;;  %v1743_v22 = vld [vmem:[#allocation8 + $0xd8] sm:$0xff] }
 0x2dc   : > { %v1408_v1 = vpop.f32.mrf.mxu2  ;;  %v1431_v9 = vpop.f32.mrf.mxu3 }
 0x2dd   : > { %v1436_v29 = vadd.f32 %v1408_v1, %v1320_v25  ;;  %v1437_v30 = vadd.f32 %v1431_v9, %v1343_v26  ;;  %v1943_v1 = vld [vmem:[#allocation8 + $0x378] sm:$0xff]  ;;  %v1821_v9 = vld [vmem:[#allocation8 + $0x1d0] sm:$0xff] }
 0x2de   : > { %1946 = vmatpush.msrb.mxu2 %v1943_v1  ;;  %1834 = vmatpush.msra.mxu3 %v1821_v9  ;;  %v1742_v25 = vld [vmem:[#allocation8 + $0xd0] sm:$0xff]  ;;  %v1939_v26 = vld [vmem:[#allocation8 + $0x358] sm:$0xff] }
 0x2df   : > { %v1529_v41 = vadd.f32 %v1501_v39, %v1436_v29  ;;  %v1530_v42 = vadd.f32 %v1524_v40, %v1437_v30  ;;  %v1741_v29 = vld [vmem:[#allocation8 + $0xc8] sm:$0xff]  ;;  %v1938_v30 = vld [vmem:[#allocation8 + $0x350] sm:$0xff] }
 0x2e0   : > { %1947 = vmatpush.msrb.mxu2 %v1942_v14  ;;  %1835 = vmatpush.msra.mxu3 %v1820_v16  ;;  %v1701_v39 = vld [vmem:[#allocation8 + $0x30] sm:$0xff]  ;;  %v1933_v14 = vld [vmem:[#allocation8 + $0x328] sm:$0xff] }
 0x2e1   : > { %v1738_v40 = vld [vmem:[#allocation8 + $0xb0] sm:$0xff]  ;;  %v1812_v16 = vld [vmem:[#allocation8 + $0x188] sm:$0xff] }
 0x2e2   : > { %1948 = vmatpush.msrb.mxu2 %v1941_v17  ;;  %1836 = vmatpush.msra.mxu3 %v1819_v20  ;;  %v1934_v1 = vld [vmem:[#allocation8 + $0x330] sm:$0xff]  ;;  %v1894_v17 = vld [vmem:[#allocation8 + $0x2a8] sm:$0xff]  ;;  %v1811_v20 = vld [vmem:[#allocation8 + $0x180] sm:$0xff] }
 0x2e3   : > { %v1813_v9 = vld [vmem:[#allocation8 + $0x190] sm:$0xff] }
 0x2e4   : > { %1949 = vmatpush.msrb.mxu2 %v1940_v23  ;;  %v1931_v23 = vld [vmem:[#allocation8 + $0x318] sm:$0xff] }
 0x2e5   : > { %v1591_v7 = vpop.f32.mrf.mxu2  ;;  %v1614_v24 = vpop.f32.mrf.mxu3 }
 0x2e6   : > { %v1620_v34 = vadd.f32 %v1591_v7, %v1527_v31  ;;  %v1621_v36 = vadd.f32 %v1614_v24, %v1528_v32  ;;  %v1818_v7 = vld [vmem:[#allocation8 + $0x1b8] sm:$0xff]  ;;  %v1705_v24 = vld [vmem:[#allocation8 + $0x50] sm:$0xff]  ;;  %v1816_v31 = vld [vmem:[#allocation8 + $0x1a8] sm:$0xff]  ;;  %1950 = vmatpush.msrb.mxu2 %v1939_v26 }
 0x2e7   : > { %1837 = vmatpush.msra.mxu3 %v1818_v7  ;;  %v1703_v32 = vld [vmem:[#allocation8 + $0x40] sm:$0xff]  ;;  %v1930_v7 = vld [vmem:[#allocation8 + $0x310] sm:$0xff]  ;;  %v1929_v26 = vld [vmem:[#allocation8 + $0x308] sm:$0xff] }
 0x2e8   : > { %v1630_v46 = vadd.f32 %v1626_v35, %v1620_v34  ;;  %v1631_v47 = vadd.f32 %v1627_v37, %v1621_v36  ;;  %v1937_v34 = vld [vmem:[#allocation8 + $0x348] sm:$0xff]  ;;  %v1702_v36 = vld [vmem:[#allocation8 + $0x38] sm:$0xff]  ;;  %1951 = vmatpush.msrb.mxu2 %v1938_v30  ;;  %v1850_v30 = vld [vmem:[#allocation8 + $0x200] sm:$0xff] }
 0x2e9   : > { %1838 = vmatpush.msra.mxu3 %v1817_v27  ;;  %v1851_v27 = vld [vmem:[#allocation8 + $0x208] sm:$0xff] }
 0x2ea   : > { %v1634_v55 = vmax.f32 %v1630_v46, 0.0  ;;  %v1635_v56 = vmax.f32 %v1631_v47, 0.0  ;;  %1952 = vmatpush.msrb.mxu2 %v1937_v34  ;;  %v1698_v46 = vld [vmem:[#allocation8 + $0x18] sm:$0xff] }
 0x2eb   : > { %1839 = vmatpush.msra.mxu3 %v1816_v31  ;;  %v1735_v47 = vld [vmem:[#allocation8 + $0x98] sm:$0xff]  ;;  %v1890_v31 = vld [vmem:[#allocation8 + $0x288] sm:$0xff] }
 0x2ec   : > { %v1638_v3 = vmax.f32 %v1634_v55, %v1635_v56  ;;  %1953 = vmatpush.msrb.mxu2 %v1936_v38  ;;  %v1904_v55 = vld [vmem:[#allocation8 + $0x2f8] sm:$0xff]  ;;  %v1864_v56 = vld [vmem:[#allocation8 + $0x270] sm:$0xff] }
 0x2ed   : > { %v1594_v44 = vpop.f32.mrf.mxu2  ;;  %v1617_v45 = vpop.f32.mrf.mxu3  ;;  %v1982_v34 = vld [vmem:[#allocation11 + $0x70] sm:$0xff] }
 0x2ee   : > { %v1622_v48 = vadd.f32 %v1594_v44, %v1529_v41  ;;  %v1623_v49 = vadd.f32 %v1617_v45, %v1530_v42  ;;  %v1935_v41 = vld [vmem:[#allocation8 + $0x338] sm:$0xff]  ;;  %v1700_v42 = vld [vmem:[#allocation8 + $0x28] sm:$0xff]  ;;  %v1699_v44 = vld [vmem:[#allocation8 + $0x20] sm:$0xff] }
 0x2ef   : > { %v1736_v45 = vld [vmem:[#allocation8 + $0xa0] sm:$0xff]  ;;  %1954 = vmatpush.msrb.mxu2 %v1935_v41  ;;  %v1978_v38 = vld [vmem:[#allocation11 + $0x50] sm:$0xff] }
 0x2f0   : > { %v1632_v51 = vadd.f32 %v1626_v35, %v1622_v48  ;;  %v1633_v52 = vadd.f32 %v1627_v37, %v1623_v49  ;;  %v1815_v35 = vld [vmem:[#allocation8 + $0x1a0] sm:$0xff]  ;;  %v1739_v37 = vld [vmem:[#allocation8 + $0xb8] sm:$0xff]  ;;  %v1697_v48 = vld [vmem:[#allocation8 + $0x10] sm:$0xff] }
 0x2f1   : > { %1840 = vmatpush.msra.mxu3 %v1815_v35  ;;  %v1734_v49 = vld [vmem:[#allocation8 + $0x90] sm:$0xff]  ;;  %1955 = vmatpush.msrb.mxu2 %v1934_v1 }
 0x2f2   : > { %v1636_v57 = vmax.f32 %v1632_v51, 0.0  ;;  %v1637_v58 = vmax.f32 %v1633_v52, 0.0  ;;  %v1733_v51 = vld [vmem:[#allocation8 + $0x88] sm:$0xff]  ;;  %v1695_v52 = vld [vmem:[#allocation8] sm:$0xff] }
 0x2f3   : > { %1841 = vmatpush.msra.mxu3 %v1814_v18  ;;  %1956 = vmatpush.msrb.mxu2 %v1933_v14  ;;  %v1981_v35 = vld [vmem:[#allocation11 + $0x68] sm:$0xff]  ;;  %v2012_v18 = vld [vmem:[#allocation14 + $0x30] sm:$0xff] }
 0x2f4   : > { %v1639_v63 = vmax.f32 %v1636_v57, %v1637_v58  ;;  %v1903_v57 = vld [vmem:[#allocation8 + $0x2f0] sm:$0xff]  ;;  %v1863_v58 = vld [vmem:[#allocation8 + $0x268] sm:$0xff] }
 0x2f5   : > { %1842 = vmatpush.msra.mxu3 %v1813_v9 }
 0x2f6   : > { %2321 = vmatpush.msk.msrb.mxu0 %vm1645_vm7, %v1639_v63  ;;  %2323 = vmatpush.msk.msra.mxu1 %vm1645_vm7, %v1639_v63  ;;  %v1901_v63 = vld [vmem:[#allocation8 + $0x2e0] sm:$0xff] }
 0x2f7   : > { %1843 = vmatpush.msra.mxu3 %v1812_v16  ;;  %v2009_v16 = vld [vmem:[#allocation14 + $0x18] sm:$0xff] }
 0x2f8   : > { %1664 = vmatpush.msrb.mxu0 %v1638_v3  ;;  %1688 = vmatpush.msra.mxu1 %v1638_v3  ;;  %v1860_v3 = vld [vmem:[#allocation8 + $0x250] sm:$0xff] }
 0x2f9   : > { %2322 = vmatmul.msk.f32.vlgmr.msrb.gmra.mxu0 %vm1641_vm8, %v1640_v4  ;;  %2324 = vmatmul.msk.f32.vlgmr.msra.gmra.mxu1 %vm1641_vm8, %v1669_v10  ;;  %v1899_v4 = vld [vmem:[#allocation8 + $0x2d0] sm:$0xff]  ;;  %v1859_v10 = vld [vmem:[#allocation8 + $0x248] sm:$0xff] }
 0x2fa   : > { %1711 = vmatpush.msra.mxu0 %v1710_v11  ;;  %1751 = vmatpush.msrb.mxu1 %v1747_v12  ;;  %v1858_v11 = vld [vmem:[#allocation8 + $0x240] sm:$0xff]  ;;  %v1857_v12 = vld [vmem:[#allocation8 + $0x238] sm:$0xff] }
 0x2fb   : > { %1844 = vmatpush.msra.mxu3 %v1811_v20 }
 0x2fc   : > { %1712 = vmatpush.msra.mxu0 %v1709_v19  ;;  %1752 = vmatpush.msrb.mxu1 %v1746_v62  ;;  %v1856_v19 = vld [vmem:[#allocation8 + $0x230] sm:$0xff]  ;;  %v1896_v62 = vld [vmem:[#allocation8 + $0x2b8] sm:$0xff] }
 0x2fe   : > { %1713 = vmatpush.msra.mxu0 %v1708_v0  ;;  %1753 = vmatpush.msrb.mxu1 %v1745_v6  ;;  %v1855_v0 = vld [vmem:[#allocation8 + $0x228] sm:$0xff]  ;;  %v1895_v6 = vld [vmem:[#allocation8 + $0x2b0] sm:$0xff] }
 0x300   : > { %1714 = vmatpush.msra.mxu0 %v1707_v8  ;;  %1754 = vmatpush.msrb.mxu1 %v1744_v15  ;;  %v1932_v8 = vld [vmem:[#allocation8 + $0x320] sm:$0xff] }
 0x301   : > { %v1854_v15 = vld [vmem:[#allocation8 + $0x220] sm:$0xff]  ;;  %1957 = vmatpush.msrb.mxu2 %v1932_v8 }
 0x302   : > { %1715 = vmatpush.msra.mxu0 %v1706_v21  ;;  %1755 = vmatpush.msrb.mxu1 %v1743_v22  ;;  %v1853_v21 = vld [vmem:[#allocation8 + $0x218] sm:$0xff]  ;;  %v1893_v22 = vld [vmem:[#allocation8 + $0x2a0] sm:$0xff] }
 0x303   : > { %1958 = vmatpush.msrb.mxu2 %v1931_v23 }
 0x304   : > { %1716 = vmatpush.msra.mxu0 %v1705_v24  ;;  %1756 = vmatpush.msrb.mxu1 %v1742_v25  ;;  %v1852_v24 = vld [vmem:[#allocation8 + $0x210] sm:$0xff]  ;;  %v1892_v25 = vld [vmem:[#allocation8 + $0x298] sm:$0xff] }
 0x305   : > { %1959 = vmatpush.msrb.mxu2 %v1930_v7  ;;  %v2008_v7 = vld [vmem:[#allocation14 + $0x10] sm:$0xff] }
 0x306   : > { %1717 = vmatpush.msra.mxu0 %v1704_v28  ;;  %1757 = vmatpush.msrb.mxu1 %v1741_v29  ;;  %v1891_v28 = vld [vmem:[#allocation8 + $0x290] sm:$0xff]  ;;  %v1928_v29 = vld [vmem:[#allocation8 + $0x300] sm:$0xff] }
 0x307   : > { %1960 = vmatpush.msrb.mxu2 %v1929_v26  ;;  %v1984_v26 = vld [vmem:[#allocation12] sm:$0x1] }
 0x308   : > { %1718 = vmatpush.msra.mxu0 %v1703_v32  ;;  %1758 = vmatpush.msrb.mxu1 %v1740_v33  ;;  %v1889_v32 = vld [vmem:[#allocation8 + $0x280] sm:$0xff] }
 0x309   : > { %1961 = vmatpush.msrb.mxu2 %v1928_v29  ;;  %v1983_v33 = vld [vmem:[#allocation11 + $0x78] sm:$0xff] }
 0x30a   : > { %1719 = vmatpush.msra.mxu0 %v1702_v36  ;;  %1759 = vmatpush.msrb.mxu1 %v1739_v37  ;;  %v1980_v36 = vld [vmem:[#allocation11 + $0x60] sm:$0xff]  ;;  %v1979_v37 = vld [vmem:[#allocation11 + $0x58] sm:$0xff] }
 0x30b   : > { %1985 = vmatpush.msrb.mxu3 %v1983_v33 }
 0x30c   : > { %1720 = vmatpush.msra.mxu0 %v1701_v39  ;;  %1760 = vmatpush.msrb.mxu1 %v1738_v40  ;;  %v1977_v39 = vld [vmem:[#allocation11 + $0x48] sm:$0xff] }
 0x30d   : > { %1986 = vmatpush.msrb.mxu3 %v1982_v34 }
 0x30e   : > { %1721 = vmatpush.msra.mxu0 %v1700_v42  ;;  %1761 = vmatpush.msrb.mxu1 %v1737_v43 }
 0x30f   : > { %1987 = vmatpush.msrb.mxu3 %v1981_v35 }
 0x310   : > { %1722 = vmatpush.msra.mxu0 %v1699_v44  ;;  %1762 = vmatpush.msrb.mxu1 %v1736_v45 }
 0x311   : > { %1988 = vmatpush.msrb.mxu3 %v1980_v36 }
 0x312   : > { %1723 = vmatpush.msra.mxu0 %v1698_v46  ;;  %1763 = vmatpush.msrb.mxu1 %v1735_v47 }
 0x313   : > { %1989 = vmatpush.msrb.mxu3 %v1979_v37 }
 0x314   : > { %1724 = vmatpush.msra.mxu0 %v1697_v48  ;;  %1764 = vmatpush.msrb.mxu1 %v1734_v49  ;;  %v1976_v49 = vld [vmem:[#allocation11 + $0x40] sm:$0xff] }
 0x315   : > { %1990 = vmatpush.msrb.mxu3 %v1978_v38 }
 0x316   : > { %1725 = vmatpush.msra.mxu0 %v1696_v50  ;;  %1765 = vmatpush.msrb.mxu1 %v1733_v51  ;;  %v1975_v50 = vld [vmem:[#allocation11 + $0x38] sm:$0xff]  ;;  %v1974_v51 = vld [vmem:[#allocation11 + $0x30] sm:$0xff] }
 0x317   : > { %1991 = vmatpush.msrb.mxu3 %v1977_v39 }
 0x318   : > { %1726 = vmatpush.msra.mxu0 %v1695_v52  ;;  %1766 = vmatpush.msrb.mxu1 %v1732_v53  ;;  %v1973_v52 = vld [vmem:[#allocation11 + $0x28] sm:$0xff]  ;;  %v1972_v53 = vld [vmem:[#allocation11 + $0x20] sm:$0xff] }
 0x319   : > { %1992 = vmatpush.msrb.mxu3 %v1976_v49 }
 0x31a   : > { %1868 = vmatpush.msrb.mxu0 %v1865_v54  ;;  %1907 = vmatpush.msra.mxu1 %v1904_v55  ;;  %v1971_v54 = vld [vmem:[#allocation11 + $0x18] sm:$0xff]  ;;  %v1970_v55 = vld [vmem:[#allocation11 + $0x10] sm:$0xff] }
 0x31b   : > { %1993 = vmatpush.msrb.mxu3 %v1975_v50 }
 0x31c   : > { %1869 = vmatpush.msrb.mxu0 %v1864_v56  ;;  %1908 = vmatpush.msra.mxu1 %v1903_v57  ;;  %v1969_v56 = vld [vmem:[#allocation11 + $0x8] sm:$0xff]  ;;  %v1968_v57 = vld [vmem:[#allocation11] sm:$0xff] }
 0x31d   : > { %1994 = vmatpush.msrb.mxu3 %v1974_v51 }
 0x31e   : > { %1870 = vmatpush.msrb.mxu0 %v1863_v58  ;;  %1909 = vmatpush.msra.mxu1 %v1902_v59  ;;  %v2021_v58 = vld [vmem:[#allocation14 + $0x78] sm:$0xff]  ;;  %v2020_v59 = vld [vmem:[#allocation14 + $0x70] sm:$0xff] }
 0x31f   : > { %1995 = vmatpush.msrb.mxu3 %v1973_v52 }
 0x320   : > { %1871 = vmatpush.msrb.mxu0 %v1862_v61  ;;  %1910 = vmatpush.msra.mxu1 %v1901_v63  ;;  %v2019_v61 = vld [vmem:[#allocation14 + $0x68] sm:$0xff]  ;;  %v2018_v63 = vld [vmem:[#allocation14 + $0x60] sm:$0xff] }
 0x321   : > { %1996 = vmatpush.msrb.mxu3 %v1972_v53 }
 0x322   : > { %1872 = vmatpush.msrb.mxu0 %v1861_v2  ;;  %1911 = vmatpush.msra.mxu1 %v1900_v60  ;;  %v2017_v2 = vld [vmem:[#allocation14 + $0x58] sm:$0xff]  ;;  %v2016_v60 = vld [vmem:[#allocation14 + $0x50] sm:$0xff] }
 0x323   : > { %1997 = vmatpush.msrb.mxu3 %v1971_v54 }
 0x324   : > { %1873 = vmatpush.msrb.mxu0 %v1860_v3  ;;  %1912 = vmatpush.msra.mxu1 %v1899_v4  ;;  %v2015_v3 = vld [vmem:[#allocation14 + $0x48] sm:$0xff]  ;;  %v1694_v4 = vld [vmem:[#allocation9] sm:$0x1] }
 0x325   : > { %1998 = vmatpush.msrb.mxu3 %v1970_v55 }
 0x326   : > { %1874 = vmatpush.msrb.mxu0 %v1859_v10  ;;  %1913 = vmatpush.msra.mxu1 %v1898_v5  ;;  %v2014_v5 = vld [vmem:[#allocation14 + $0x40] sm:$0xff] }
 0x327   : > { %1999 = vmatpush.msrb.mxu3 %v1969_v56 }
 0x328   : > { %1875 = vmatpush.msrb.mxu0 %v1858_v11  ;;  %1914 = vmatpush.msra.mxu1 %v1897_v13 }
 0x329   : > { %2000 = vmatpush.msrb.mxu3 %v1968_v57 }
 0x32a   : > { %1876 = vmatpush.msrb.mxu0 %v1857_v12  ;;  %1915 = vmatpush.msra.mxu1 %v1896_v62  ;;  %v2013_v12 = vld [vmem:[#allocation14 + $0x38] sm:$0xff]  ;;  %v2011_v62 = vld [vmem:[#allocation14 + $0x28] sm:$0xff] }
 0x32c   : > { %1877 = vmatpush.msrb.mxu0 %v1856_v19  ;;  %1916 = vmatpush.msra.mxu1 %v1895_v6 }
 0x32e   : > { %1878 = vmatpush.msrb.mxu0 %v1855_v0  ;;  %1917 = vmatpush.msra.mxu1 %v1894_v17  ;;  %v2010_v0 = vld [vmem:[#allocation14 + $0x20] sm:$0xff] }
 0x330   : > { %1879 = vmatpush.msrb.mxu0 %v1854_v15  ;;  %1918 = vmatpush.msra.mxu1 %v1893_v22 }
 0x332   : > { %1880 = vmatpush.msrb.mxu0 %v1853_v21  ;;  %1919 = vmatpush.msra.mxu1 %v1892_v25  ;;  %v2006_v25 = vld [vmem:[#allocation14] sm:$0xff] }
 0x334   : > { %1881 = vmatpush.msrb.mxu0 %v1852_v24  ;;  %1920 = vmatpush.msra.mxu1 %v1891_v28  ;;  %v2007_v24 = vld [vmem:[#allocation14 + $0x8] sm:$0xff] }
 0x336   : > { %1882 = vmatpush.msrb.mxu0 %v1851_v27  ;;  %1921 = vmatpush.msra.mxu1 %v1890_v31 }
 0x338   : > { %1883 = vmatpush.msrb.mxu0 %v1850_v30  ;;  %1922 = vmatpush.msra.mxu1 %v1889_v32  ;;  %v2022_v30 = vld [vmem:[#allocation15] sm:$0x1] }
 0x376   : > { %v1666_v40 = vpop.f32.mrf.mxu0  ;;  %v1690_v41 = vpop.f32.mrf.mxu1 }
 0x377   : > { %v1693_v42 = vmax.f32 %v1666_v40, %v1690_v41 }
 0x379   : > { %v1788_v43 = vrot.slane %v1693_v42, 2  ;;  %1727 = vmatmul.f32.vlgmr.msra.gmra.mxu0 %v1693_v42  ;;  %v1827_v44 = vrot.slane %v1693_v42, 3  ;;  %v1749_v45 = vrot.slane %v1693_v42, 1  ;;  %v1866_v46 = vrot.slane %v1693_v42, 4 }
 0x37a   : > { %v1944_v47 = vrot.slane %v1693_v42, 6  ;;  %v1905_v48 = vrot.slane %v1693_v42, 5  ;;  %2023 = vmatpush.msra.mxu0 %v2021_v58 }
 0x37b   : > { %1806 = vmatmul.f32.vlgmr.msra.gmra.mxu2 %v1788_v43  ;;  %1845 = vmatmul.f32.vlgmr.msra.gmra.mxu3 %v1827_v44 }
 0x37c   : > { %1767 = vmatmul.f32.vlgmr.msrb.gmra.mxu1 %v1749_v45  ;;  %2024 = vmatpush.msra.mxu0 %v2020_v59 }
 0x37e   : > { %2025 = vmatpush.msra.mxu0 %v2019_v61 }
 0x380   : > { %2026 = vmatpush.msra.mxu0 %v2018_v63 }
 0x381   : > { %1884 = vmatmul.f32.vlgmr.msrb.gmra.mxu0 %v1866_v46 }
 0x382   : > { %2027 = vmatpush.msra.mxu0 %v2017_v2 }
 0x383   : > { %1962 = vmatmul.f32.vlgmr.msrb.gmra.mxu2 %v1944_v47 }
 0x384   : > { %1923 = vmatmul.f32.vlgmr.msra.gmra.mxu1 %v1905_v48  ;;  %2028 = vmatpush.msra.mxu0 %v2016_v60 }
 0x386   : > { %2029 = vmatpush.msra.mxu0 %v2015_v3 }
 0x388   : > { %2030 = vmatpush.msra.mxu0 %v2014_v5 }
 0x38a   : > { %2031 = vmatpush.msra.mxu0 %v2013_v12 }
 0x38c   : > { %2032 = vmatpush.msra.mxu0 %v2012_v18 }
 0x38e   : > { %2033 = vmatpush.msra.mxu0 %v2011_v62 }
 0x390   : > { %2034 = vmatpush.msra.mxu0 %v2010_v0 }
 0x392   : > { %2035 = vmatpush.msra.mxu0 %v2009_v16 }
 0x394   : > { %2036 = vmatpush.msra.mxu0 %v2008_v7 }
 0x396   : > { %2037 = vmatpush.msra.mxu0 %v2007_v24 }
 0x398   : > { %2038 = vmatpush.msra.mxu0 %v2006_v25 }
 0x3f6   : > { %v1728_v10 = vpop.f32.mrf.mxu0 }
 0x3f7   : > { %v1731_v11 = vadd.f32 %v1728_v10, %v1694_v4 }
 0x3f9   : > { %v1768_v13 = vpop.f32.mrf.mxu1 }
 0x3fa   : > { %v1771_v19 = vadd.f32 %v1768_v13, %v1731_v11 }
 0x3fe   : > { %v1807_v1 = vpop.f32.mrf.mxu2  ;;  %v1846_v6 = vpop.f32.mrf.mxu3 }
 0x3ff   : > { %v1810_v9 = vadd.f32 %v1807_v1, %v1771_v19  ;;  %v1885_v8 = vpop.f32.mrf.mxu0 }
 0x401   : > { %v1849_v14 = vadd.f32 %v1846_v6, %v1810_v9  ;;  %v1924_v17 = vpop.f32.mrf.mxu1 }
 0x403   : > { %v1888_v15 = vadd.f32 %v1885_v8, %v1849_v14 }
 0x405   : > { %v1927_v20 = vadd.f32 %v1924_v17, %v1888_v15 }
 0x406   : > { %v1963_v21 = vpop.f32.mrf.mxu2 }
 0x407   : > { %v1966_v22 = vadd.f32 %v1963_v21, %v1927_v20 }
 0x409   : > { %v1967_v23 = vmax.f32 %v1966_v22, 0.0 }
 0x40b   : > { %2001 = vmatmul.f32.vlgmr.msrb.gmra.mxu3 %v1967_v23 }
 0x48e   : > { %v2002_v27 = vpop.f32.mrf.mxu3 }
 0x48f   : > { %v2003_v28 = vadd.f32 %v2002_v27, %v1984_v26 }
 0x491   : > { %v2005_v29 = vmax.f32 %v2003_v28, 0.0 }
 0x493   : > { %2039 = vmatmul.f32.vlgmr.msra.gmra.mxu0 %v2005_v29 }
 0x510   : > { %v2040_v31 = vpop.f32.mrf.mxu0 }
 0x511   : > { %v2041_v32 = vadd.f32 %v2040_v31, %v2022_v30 }
 0x513   : > { %2043 = vst [vmem:[%s611_s10] sm:$0x1] %v2041_v32 }
 0x514   : > { %2725 = shalt.err (!%p2722_p8)
}
 0x515   : > { %2364 = dma.vmem_to_hbm [thread:$0]  (%p2914_p5), %s2056_s18, 16, %s2058_s17, %s2045_s23  }
 0x516 PF: > { %s3328_s9 = sld [smem:[#allocation26_spill]] }
 0x517   : > { %s3329_s30 = sld [smem:[#allocation24_spill]] }
 0x51c   : > { %p2411_p9 = scmp.ge.s32.totalorder %s3328_s9, 2 }
 0x51d   : > { %s2069_s28 = sand.u32 1, %s3329_s30  }
 0x51e   : > { %p2392_p10 = pnand %p2411_p9, %p2918_p6  ;;  %s2070_s27 = scalar_lea.sflag [#allocation5], %s2069_s28 }
 0x520   : > { %p2393_p11 = pneg %p2392_p10 }
 0x522   : > { %2763 = dma.done.wait (%p2393_p11), %s2070_s27, 16  }
 0x523   : > { %2765 = vsyncadd (%p2393_p11), %s2070_s27, 4294967280  ;;  %s3331_s21 = sld [smem:[#allocation27_spill]]  ;;  %s3334_s18 = smov %s2772_s19 }
 0x524   : > { %s3332_s16 = sld [smem:[#allocation25_spill]] }
 0x525   : > { %s3333_s20 = sld [smem:[#allocation28_spill]] }
 0x529   : > { %p30_p12 = scmp.ge.s32.totalorder %s3331_s21, 4  }
 0x52a   : > { %s3335_s19 = smov %s3332_s16 }
 0x52b   :  { %32 = sbr.rel (!%p30_p12) target bundleno = 13 (0xd), region = 156 }
 0x530   :  { %2075 = vsyncpa [#allocation4], 1 }
 0x531   :  { %2077 = vsyncpa [#allocation4 + $0x1], 1 }
 0x532   :  { %2078 = vsyncpa [#allocation7], 1 }
 0x533   :  { %2079 = vsyncpa [#allocation10], 1 }
 0x534   :  { %2080 = vsyncpa [#allocation13], 1 }
 0x535   :  { %2081 = vsyncpa [#allocation16], 1 }
 0x536   :  { %2082 = vsyncpa [#allocation5], 1 }
 0x537   :  { %2084 = vsyncpa [#allocation5 + $0x1], 1 }

</bundles_post_ra>
